<compile_context>
chip_gen: v7x
topology: tpu7x:2x2x1
jax: 0.10.0
libtpu: 0.0.40
codegen_flags: <defaults>
</compile_context>

<pallas_src>
import functools
import math

import jax
import jax.numpy as jnp
import numpy as np
from jax.experimental import pallas as pl
from jax.experimental.pallas import tpu as pltpu

BN_EPS = 1e-5          # torch.nn.BatchNorm2d default eps
_ROW0 = 8              # 8-aligned sublane offset at which activations are staged


# (layer name, op kind, followed-by ReLU+BatchNorm?) — mirrors ProbLightWeight
_LAYERS = (
    ("cd0", "conv", True),            # ProbConv2d(3,   nf, 3)  + ReLU + BN(nf)
    ("cd1", "conv", True),            # ProbConv2d(nf, 2nf, 3)  + ReLU + BN(2nf)
    ("cd2", "conv", True),            # ProbConv2d(2nf,2nf, 3)  + ReLU + BN(2nf)
    ("cu0", "conv_transpose", True),  # ProbConvTranspose2d(2nf,2nf,3) + ReLU + BN(2nf)
    ("cu1", "conv_transpose", True),  # ProbConvTranspose2d(2nf, nf,3) + ReLU + BN(nf)
    ("cu2", "conv_transpose", False), # ProbConvTranspose2d(nf,  1, 3)
)


# ------------------------------- fused kernel --------------------------------

def _fused_unet_kernel(x_ref, w0, w1, w2, w3, w4, w5, aux_ref, o_ref, act_ref,
                       *, meta):
    """Runs the whole 6-layer network for one batch element, VMEM-resident.

    meta: static tuple of (h_in, k=Win*Cin, oh, n_cols=Wout*Cout, pad, relu_bn, kh)
    """
    band_refs = (w0, w1, w2, w3, w4, w5)
    x = x_ref[0]                                        # (H, W*C) f32
    for i, (h_in, k, oh, n_cols, pad, relu_bn, kh_taps) in enumerate(meta):
        # --- stage the activation (with zeroed height padding) in VMEM scratch ---
        if pad:
            act_ref[...] = jnp.zeros(act_ref.shape, act_ref.dtype)
        act_ref[_ROW0:_ROW0 + h_in, 0:k] = x            # aligned-row store
        # --- conv = sum over the KH kernel rows of row-slab @ banded weight ------
        acc = jnp.zeros((oh, n_cols), jnp.float32)
        for kh in range(kh_taps):
            r0 = _ROW0 - pad + kh
            slab = act_ref[r0:r0 + oh, 0:k]             # (oh, Win*Cin)
            acc = acc + jnp.dot(slab, band_refs[i][kh],
                                preferred_element_type=jnp.float32)
        # --- bias (BN scale pre-folded) + ReLU + BN shift -------------------------
        acc = acc + aux_ref[2 * i:2 * i + 1, 0:n_cols]
        if relu_bn:
            acc = jnp.maximum(acc, 0.0) + aux_ref[2 * i + 1:2 * i + 2, 0:n_cols]
        x = acc                                         # (oh, Wout*Cout) -> next layer
    o_ref[0] = x.astype(o_ref.dtype)


# -------------------------- host-side operand prep ---------------------------

def _build_band(w_eff, w_in, pad):
    """Banded weight matrix folding the kw taps AND the width zero-padding.

    band[kh, w*Cin + ci, ow*Cout + co] = w_eff[kh, w - ow + pad, ci, co]
    (zero when the tap index w - ow + pad falls outside [0, KW)).
    """
    kh, kw, cin, cout = w_eff.shape
    w_out = w_in + 2 * pad - kw + 1
    tap = np.arange(w_in)[:, None] - np.arange(w_out)[None, :] + pad   # (Win, Wout)
    valid = (tap >= 0) & (tap < kw)
    tap = np.clip(tap, 0, kw - 1)
    g = w_eff[:, tap, :, :]                              # (KH, Win, Wout, Cin, Cout)
    g = g * valid[None, :, :, None, None]
    return jnp.transpose(g, (0, 1, 3, 2, 4)).reshape(kh, w_in * cin, w_out * cout)


def _prepare_operands(params, h0, w0, c0):
    """Band weights, packed bias/shift rows and static per-layer metadata."""
    bands, rows, meta = [], [], []
    hc, wc, cc = h0, w0, c0
    for name, kind, relu_bn in _LAYERS:
        w_t = params[name + "_w"].astype(jnp.float32)
        bias = params[name + "_b"].astype(jnp.float32)
        if kind == "conv":                  # torch Conv2d weight (Cout, Cin, KH, KW), pad=0
            w_eff = jnp.transpose(w_t, (2, 3, 1, 0))
            pad = 0
        else:                               # torch ConvTranspose2d weight (Cin, Cout, KH, KW)
            # stride=1, padding=0  ==  full conv with the flipped kernel
            w_eff = jnp.transpose(w_t[:, :, ::-1, ::-1], (2, 3, 0, 1))
            pad = w_t.shape[-1] - 1
        kh, kw, cin, cout = w_eff.shape
        assert cin == cc
        if relu_bn:                         # eval BatchNorm2d(affine=False)
            scale = 1.0 / jnp.sqrt(params[name + "_bn_var"].astype(jnp.float32) + BN_EPS)
            shift = -params[name + "_bn_mean"].astype(jnp.float32) * scale
        else:
            scale = jnp.ones((cout,), jnp.float32)
            shift = jnp.zeros((cout,), jnp.float32)
        # Fold the (positive) BN scale into weights & bias:
        #   relu(conv + b) * s + t  ==  relu(conv*s + b*s) + t
        w_eff = w_eff * scale[None, None, None, :]
        bias_f = bias * scale

        oh, ow = hc + 2 * pad - kh + 1, wc + 2 * pad - kw + 1
        bands.append(_build_band(w_eff, wc, pad))
        rows.append((jnp.tile(bias_f, ow), jnp.tile(shift, ow)))
        meta.append((hc, wc * cc, oh, ow * cout, pad, relu_bn, kh))
        hc, wc, cc = oh, ow, cout

    l_max = max(m[3] for m in meta)
    aux = jnp.zeros((2 * len(meta), l_max), jnp.float32)
    for i, (b_row, s_row) in enumerate(rows):
        aux = aux.at[2 * i, :b_row.shape[0]].set(b_row)
        aux = aux.at[2 * i + 1, :s_row.shape[0]].set(s_row)
    return bands, aux, tuple(meta), (hc, wc, cc)


def prob_lightweight_forward(x_nchw, params):
    """Deterministic forward: eval mode, sample=False (weight = posterior mu)."""
    # TODO(synk): training-mode Gaussian weight sampling and KL-divergence
    # accumulation are stateful torch side effects and are not reproduced here.
    x_nhwc = jnp.transpose(x_nchw.astype(jnp.float32), (0, 2, 3, 1))   # NCHW -> NHWC
    n, h, w, c = x_nhwc.shape
    bands, aux, meta, (h_out, w_fin, c_out) = _prepare_operands(params, h, w, c)
    assert c_out == 1                      # ProbLightWeight always ends in 1 channel
    out_rows, out_cols = meta[-1][2], meta[-1][3]
    x2d = x_nhwc.reshape(n, h, w * c)      # (H, W*C) layout used inside the kernel

    # staging scratch: 8x128-aligned, covers the largest height-padded activation
    sc_h = -(-(_ROW0 + max(m[0] + m[4] for m in meta)) // 8) * 8
    sc_w = -(-max(m[1] for m in meta) // 128) * 128

    in_specs = [pl.BlockSpec((1, h, w * c), lambda i: (i, 0, 0))]
    in_specs += [pl.BlockSpec(b.shape, lambda i: (0, 0, 0)) for b in bands]
    in_specs += [pl.BlockSpec(aux.shape, lambda i: (0, 0))]

    out = pl.pallas_call(
        functools.partial(_fused_unet_kernel, meta=meta),
        out_shape=jax.ShapeDtypeStruct((n, out_rows, out_cols), jnp.float32),
        grid=(n,),
        in_specs=in_specs,
        out_specs=pl.BlockSpec((1, out_rows, out_cols), lambda i: (i, 0, 0)),
        scratch_shapes=[pltpu.VMEM((sc_h, sc_w), jnp.float32)],
        compiler_params=pltpu.CompilerParams(dimension_semantics=("parallel",)),
    )(x2d, *bands, aux)
    return out.reshape(n, 1, out_rows, out_cols)   # Cout == 1  ->  NCHW


# ----------------------- deterministic parameter init -----------------------

def _xavier_uniform(key, shape, gain):
    receptive = math.prod(shape[2:])
    fan_in, fan_out = shape[1] * receptive, shape[0] * receptive
    a = gain * math.sqrt(6.0 / (fan_in + fan_out))
    return jax.random.uniform(key, shape, jnp.float32, -a, a)


def init_params(key, nf):
    gain = math.sqrt(2.0)  # relu gain, as in init_conv_weights
    shapes = {
        "cd0": ((nf, 3, 3, 3), nf),                # Conv2d weight (Cout, Cin, 3, 3)
        "cd1": ((2 * nf, nf, 3, 3), 2 * nf),
        "cd2": ((2 * nf, 2 * nf, 3, 3), 2 * nf),
        "cu0": ((2 * nf, 2 * nf, 3, 3), 2 * nf),   # ConvT weight (Cin, Cout, 3, 3)
        "cu1": ((2 * nf, nf, 3, 3), nf),
        "cu2": ((nf, 1, 3, 3), 1),
    }
    params = {}
    keys = iter(jax.random.split(key, 4 * len(shapes)))
    for name, (w_shape, cout) in shapes.items():
        params[name + "_w"] = _xavier_uniform(next(keys), w_shape, gain)
        params[name + "_b"] = jax.random.uniform(next(keys), (cout,), jnp.float32, -0.1, 0.1)
        if name != "cu2":
            # BatchNorm2d(affine=False) running stats (synthetic, deterministic)
            params[name + "_bn_mean"] = 0.1 * jax.random.normal(next(keys), (cout,), jnp.float32)
            params[name + "_bn_var"] = jax.random.uniform(next(keys), (cout,), jnp.float32, 0.5, 1.5)
        else:
            next(keys); next(keys)
    return params


# ------------------------------ pure-JAX reference ---------------------------

def _reference_forward(x_nchw, params):
    x = jnp.transpose(x_nchw.astype(jnp.float32), (0, 2, 3, 1))
    for name, kind, relu_bn in _LAYERS:
        w_t = params[name + "_w"]
        K = w_t.shape[-1]
        if kind == "conv":
            w = jnp.transpose(w_t, (2, 3, 1, 0))
            pad = "VALID"
        else:
            w = jnp.transpose(w_t[:, :, ::-1, ::-1], (2, 3, 0, 1))
            pad = [(K - 1, K - 1), (K - 1, K - 1)]
        y = jax.lax.conv_general_dilated(
            x, w, (1, 1), pad, dimension_numbers=("NHWC", "HWIO", "NHWC"),
            precision=jax.lax.Precision.HIGHEST)
        y = y + params[name + "_b"].reshape(1, 1, 1, -1)
        if relu_bn:
            y = jnp.maximum(y, 0.0)
            y = (y - params[name + "_bn_mean"]) / jnp.sqrt(params[name + "_bn_var"] + BN_EPS)
        x = y
    return jnp.transpose(x, (0, 3, 1, 2))


if __name__ == "__main__":
    nf = 8                     # num_filters kept small for the synthetic test
    N, Cin, H, W = 2, 3, 16, 16
    root = jax.random.PRNGKey(0)
    k_params, k_x = jax.random.split(root)
    params = init_params(k_params, nf)
    x = jax.random.normal(k_x, (N, Cin, H, W), jnp.float32)

    y = jax.jit(prob_lightweight_forward)(x, params)
    y = jax.block_until_ready(y)
    assert y.shape == (N, 1, H, W), y.shape

    y_ref = _reference_forward(x, params)
    err = float(jnp.max(jnp.abs(y - y_ref)))
    assert jnp.allclose(y, y_ref, rtol=2e-2, atol=2e-2), err

    print("KERNEL_OK")
</pallas_src>

<mosaic_0001>
module attributes {stable_mosaic.version = 11 : i64} {
  func.func @_fused_unet_kernel(%arg0: i32, %arg1: memref<1x16x48xf32, #tpu.memory_space<vmem>>, %arg2: memref<3x48x112xf32, #tpu.memory_space<vmem>>, %arg3: memref<3x112x192xf32, #tpu.memory_space<vmem>>, %arg4: memref<3x192x160xf32, #tpu.memory_space<vmem>>, %arg5: memref<3x160x192xf32, #tpu.memory_space<vmem>>, %arg6: memref<3x192x112xf32, #tpu.memory_space<vmem>>, %arg7: memref<3x112x16xf32, #tpu.memory_space<vmem>>, %arg8: memref<12x192xf32, #tpu.memory_space<vmem>>, %arg9: memref<1x16x16xf32, #tpu.memory_space<vmem>>, %arg10: memref<24x256xf32, #tpu.memory_space<vmem>>) attributes {dimension_semantics = [#tpu.dimension_semantics<parallel>], iteration_bounds = array<i64: 2>, scalar_prefetch = 0 : i64, scratch_operands = 1 : i64, tpu.core_type = #tpu.core_type<tc>, window_params = [{transform_indices = @transform_0, window_bounds = array<i64: 1, 16, 48>}, {pipeline_mode = #tpu.pipeline_mode<synchronous>, transform_indices = @transform_1, window_bounds = array<i64: 3, 48, 112>}, {pipeline_mode = #tpu.pipeline_mode<synchronous>, transform_indices = @transform_2, window_bounds = array<i64: 3, 112, 192>}, {pipeline_mode = #tpu.pipeline_mode<synchronous>, transform_indices = @transform_3, window_bounds = array<i64: 3, 192, 160>}, {pipeline_mode = #tpu.pipeline_mode<synchronous>, transform_indices = @transform_4, window_bounds = array<i64: 3, 160, 192>}, {pipeline_mode = #tpu.pipeline_mode<synchronous>, transform_indices = @transform_5, window_bounds = array<i64: 3, 192, 112>}, {pipeline_mode = #tpu.pipeline_mode<synchronous>, transform_indices = @transform_6, window_bounds = array<i64: 3, 112, 16>}, {pipeline_mode = #tpu.pipeline_mode<synchronous>, transform_indices = @transform_7, window_bounds = array<i64: 12, 192>}, {transform_indices = @transform_8, window_bounds = array<i64: 1, 16, 16>}]} {
    %c0 = arith.constant 0 : index
    %c0_0 = arith.constant 0 : index
    %c0_1 = arith.constant 0 : index
    %0 = vector.load %arg1[%c0, %c0_0, %c0_1] : memref<1x16x48xf32, #tpu.memory_space<vmem>>, vector<1x16x48xf32>
    %1 = vector.shape_cast %0 : vector<1x16x48xf32> to vector<16x48xf32>
    %c8 = arith.constant 8 : index
    %c0_2 = arith.constant 0 : index
    %2 = vector.load %arg10[%c8, %c0_2] : memref<24x256xf32, #tpu.memory_space<vmem>>, vector<16x48xf32>
    tpu.vector_store %arg10[%c8, %c0_2], %1 {strides = array<i32>} : memref<24x256xf32, #tpu.memory_space<vmem>>, vector<16x48xf32>,
    %cst = arith.constant 0.000000e+00 : f32
    %3 = vector.broadcast %cst : f32 to vector<14x112xf32>
    %c8_3 = arith.constant 8 : index
    %c0_4 = arith.constant 0 : index
    %4 = vector.load %arg10[%c8_3, %c0_4] : memref<24x256xf32, #tpu.memory_space<vmem>>, vector<14x48xf32>
    %c0_5 = arith.constant 0 : index
    %c0_6 = arith.constant 0 : index
    %c0_7 = arith.constant 0 : index
    %5 = vector.load %arg2[%c0_5, %c0_6, %c0_7] : memref<3x48x112xf32, #tpu.memory_space<vmem>>, vector<1x48x112xf32>
    %6 = vector.shape_cast %5 : vector<1x48x112xf32> to vector<48x112xf32>
    %cst_8 = arith.constant dense<0.000000e+00> : vector<14x112xf32>
    %7 = tpu.matmul %4, %6, %cst_8 {dimension_numbers = #tpu.dot_dimension_numbers<[1], [0], [0], [1], [0, 0, 1, 1], [], []>} : vector<14x48xf32>, vector<48x112xf32>, vector<14x112xf32> -> vector<14x112xf32>
    %8 = arith.addf %3, %7 : vector<14x112xf32>
    %c9 = arith.constant 9 : index
    %c0_9 = arith.constant 0 : index
    %9 = vector.load %arg10[%c9, %c0_9] : memref<24x256xf32, #tpu.memory_space<vmem>>, vector<14x48xf32>
    %c1 = arith.constant 1 : index
    %c0_10 = arith.constant 0 : index
    %c0_11 = arith.constant 0 : index
    %10 = vector.load %arg2[%c1, %c0_10, %c0_11] : memref<3x48x112xf32, #tpu.memory_space<vmem>>, vector<1x48x112xf32>
    %11 = vector.shape_cast %10 : vector<1x48x112xf32> to vector<48x112xf32>
    %cst_12 = arith.constant dense<0.000000e+00> : vector<14x112xf32>
    %12 = tpu.matmul %9, %11, %cst_12 {dimension_numbers = #tpu.dot_dimension_numbers<[1], [0], [0], [1], [0, 0, 1, 1], [], []>} : vector<14x48xf32>, vector<48x112xf32>, vector<14x112xf32> -> vector<14x112xf32>
    %13 = arith.addf %8, %12 : vector<14x112xf32>
    %c10 = arith.constant 10 : index
    %c0_13 = arith.constant 0 : index
    %14 = vector.load %arg10[%c10, %c0_13] : memref<24x256xf32, #tpu.memory_space<vmem>>, vector<14x48xf32>
    %c2 = arith.constant 2 : index
    %c0_14 = arith.constant 0 : index
    %c0_15 = arith.constant 0 : index
    %15 = vector.load %arg2[%c2, %c0_14, %c0_15] : memref<3x48x112xf32, #tpu.memory_space<vmem>>, vector<1x48x112xf32>
    %16 = vector.shape_cast %15 : vector<1x48x112xf32> to vector<48x112xf32>
    %cst_16 = arith.constant dense<0.000000e+00> : vector<14x112xf32>
    %17 = tpu.matmul %14, %16, %cst_16 {dimension_numbers = #tpu.dot_dimension_numbers<[1], [0], [0], [1], [0, 0, 1, 1], [], []>} : vector<14x48xf32>, vector<48x112xf32>, vector<14x112xf32> -> vector<14x112xf32>
    %18 = arith.addf %13, %17 : vector<14x112xf32>
    %c0_17 = arith.constant 0 : index
    %c0_18 = arith.constant 0 : index
    %19 = vector.load %arg8[%c0_17, %c0_18] : memref<12x192xf32, #tpu.memory_space<vmem>>, vector<1x112xf32>
    %20 = vector.broadcast %19 : vector<1x112xf32> to vector<14x112xf32>
    %21 = arith.addf %18, %20 : vector<14x112xf32>
    %cst_19 = arith.constant 0.000000e+00 : f32
    %22 = vector.broadcast %cst_19 : f32 to vector<14x112xf32>
    %23 = arith.maximumf %21, %22 : vector<14x112xf32>
    %c1_20 = arith.constant 1 : index
    %c0_21 = arith.constant 0 : index
    %24 = vector.load %arg8[%c1_20, %c0_21] : memref<12x192xf32, #tpu.memory_space<vmem>>, vector<1x112xf32>
    %25 = vector.broadcast %24 : vector<1x112xf32> to vector<14x112xf32>
    %26 = arith.addf %23, %25 : vector<14x112xf32>
    %c8_22 = arith.constant 8 : index
    %c0_23 = arith.constant 0 : index
    %27 = vector.load %arg10[%c8_22, %c0_23] : memref<24x256xf32, #tpu.memory_space<vmem>>, vector<14x112xf32>
    tpu.vector_store %arg10[%c8_22, %c0_23], %26 {strides = array<i32>} : memref<24x256xf32, #tpu.memory_space<vmem>>, vector<14x112xf32>,
    %cst_24 = arith.constant 0.000000e+00 : f32
    %28 = vector.broadcast %cst_24 : f32 to vector<12x192xf32>
    %c8_25 = arith.constant 8 : index
    %c0_26 = arith.constant 0 : index
    %29 = vector.load %arg10[%c8_25, %c0_26] : memref<24x256xf32, #tpu.memory_space<vmem>>, vector<12x112xf32>
    %c0_27 = arith.constant 0 : index
    %c0_28 = arith.constant 0 : index
    %c0_29 = arith.constant 0 : index
    %30 = vector.load %arg3[%c0_27, %c0_28, %c0_29] : memref<3x112x192xf32, #tpu.memory_space<vmem>>, vector<1x112x192xf32>
    %31 = vector.shape_cast %30 : vector<1x112x192xf32> to vector<112x192xf32>
    %cst_30 = arith.constant dense<0.000000e+00> : vector<12x192xf32>
    %32 = tpu.matmul %29, %31, %cst_30 {dimension_numbers = #tpu.dot_dimension_numbers<[1], [0], [0], [1], [0, 0, 1, 1], [], []>} : vector<12x112xf32>, vector<112x192xf32>, vector<12x192xf32> -> vector<12x192xf32>
    %33 = arith.addf %28, %32 : vector<12x192xf32>
    %c9_31 = arith.constant 9 : index
    %c0_32 = arith.constant 0 : index
    %34 = vector.load %arg10[%c9_31, %c0_32] : memref<24x256xf32, #tpu.memory_space<vmem>>, vector<12x112xf32>
    %c1_33 = arith.constant 1 : index
    %c0_34 = arith.constant 0 : index
    %c0_35 = arith.constant 0 : index
    %35 = vector.load %arg3[%c1_33, %c0_34, %c0_35] : memref<3x112x192xf32, #tpu.memory_space<vmem>>, vector<1x112x192xf32>
    %36 = vector.shape_cast %35 : vector<1x112x192xf32> to vector<112x192xf32>
    %cst_36 = arith.constant dense<0.000000e+00> : vector<12x192xf32>
    %37 = tpu.matmul %34, %36, %cst_36 {dimension_numbers = #tpu.dot_dimension_numbers<[1], [0], [0], [1], [0, 0, 1, 1], [], []>} : vector<12x112xf32>, vector<112x192xf32>, vector<12x192xf32> -> vector<12x192xf32>
    %38 = arith.addf %33, %37 : vector<12x192xf32>
    %c10_37 = arith.constant 10 : index
    %c0_38 = arith.constant 0 : index
    %39 = vector.load %arg10[%c10_37, %c0_38] : memref<24x256xf32, #tpu.memory_space<vmem>>, vector<12x112xf32>
    %c2_39 = arith.constant 2 : index
    %c0_40 = arith.constant 0 : index
    %c0_41 = arith.constant 0 : index
    %40 = vector.load %arg3[%c2_39, %c0_40, %c0_41] : memref<3x112x192xf32, #tpu.memory_space<vmem>>, vector<1x112x192xf32>
    %41 = vector.shape_cast %40 : vector<1x112x192xf32> to vector<112x192xf32>
    %cst_42 = arith.constant dense<0.000000e+00> : vector<12x192xf32>
    %42 = tpu.matmul %39, %41, %cst_42 {dimension_numbers = #tpu.dot_dimension_numbers<[1], [0], [0], [1], [0, 0, 1, 1], [], []>} : vector<12x112xf32>, vector<112x192xf32>, vector<12x192xf32> -> vector<12x192xf32>
    %43 = arith.addf %38, %42 : vector<12x192xf32>
    %c2_43 = arith.constant 2 : index
    %c0_44 = arith.constant 0 : index
    %44 = vector.load %arg8[%c2_43, %c0_44] : memref<12x192xf32, #tpu.memory_space<vmem>>, vector<1x192xf32>
    %45 = vector.broadcast %44 : vector<1x192xf32> to vector<12x192xf32>
    %46 = arith.addf %43, %45 : vector<12x192xf32>
    %cst_45 = arith.constant 0.000000e+00 : f32
    %47 = vector.broadcast %cst_45 : f32 to vector<12x192xf32>
    %48 = arith.maximumf %46, %47 : vector<12x192xf32>
    %c3 = arith.constant 3 : index
    %c0_46 = arith.constant 0 : index
    %49 = vector.load %arg8[%c3, %c0_46] : memref<12x192xf32, #tpu.memory_space<vmem>>, vector<1x192xf32>
    %50 = vector.broadcast %49 : vector<1x192xf32> to vector<12x192xf32>
    %51 = arith.addf %48, %50 : vector<12x192xf32>
    %c8_47 = arith.constant 8 : index
    %c0_48 = arith.constant 0 : index
    %52 = vector.load %arg10[%c8_47, %c0_48] : memref<24x256xf32, #tpu.memory_space<vmem>>, vector<12x192xf32>
    tpu.vector_store %arg10[%c8_47, %c0_48], %51 {strides = array<i32>} : memref<24x256xf32, #tpu.memory_space<vmem>>, vector<12x192xf32>,
    %cst_49 = arith.constant 0.000000e+00 : f32
    %53 = vector.broadcast %cst_49 : f32 to vector<10x160xf32>
    %c8_50 = arith.constant 8 : index
    %c0_51 = arith.constant 0 : index
    %54 = vector.load %arg10[%c8_50, %c0_51] : memref<24x256xf32, #tpu.memory_space<vmem>>, vector<10x192xf32>
    %c0_52 = arith.constant 0 : index
    %c0_53 = arith.constant 0 : index
    %c0_54 = arith.constant 0 : index
    %55 = vector.load %arg4[%c0_52, %c0_53, %c0_54] : memref<3x192x160xf32, #tpu.memory_space<vmem>>, vector<1x192x160xf32>
    %56 = vector.shape_cast %55 : vector<1x192x160xf32> to vector<192x160xf32>
    %cst_55 = arith.constant dense<0.000000e+00> : vector<10x160xf32>
    %57 = tpu.matmul %54, %56, %cst_55 {dimension_numbers = #tpu.dot_dimension_numbers<[1], [0], [0], [1], [0, 0, 1, 1], [], []>} : vector<10x192xf32>, vector<192x160xf32>, vector<10x160xf32> -> vector<10x160xf32>
    %58 = arith.addf %53, %57 : vector<10x160xf32>
    %c9_56 = arith.constant 9 : index
    %c0_57 = arith.constant 0 : index
    %59 = vector.load %arg10[%c9_56, %c0_57] : memref<24x256xf32, #tpu.memory_space<vmem>>, vector<10x192xf32>
    %c1_58 = arith.constant 1 : index
    %c0_59 = arith.constant 0 : index
    %c0_60 = arith.constant 0 : index
    %60 = vector.load %arg4[%c1_58, %c0_59, %c0_60] : memref<3x192x160xf32, #tpu.memory_space<vmem>>, vector<1x192x160xf32>
    %61 = vector.shape_cast %60 : vector<1x192x160xf32> to vector<192x160xf32>
    %cst_61 = arith.constant dense<0.000000e+00> : vector<10x160xf32>
    %62 = tpu.matmul %59, %61, %cst_61 {dimension_numbers = #tpu.dot_dimension_numbers<[1], [0], [0], [1], [0, 0, 1, 1], [], []>} : vector<10x192xf32>, vector<192x160xf32>, vector<10x160xf32> -> vector<10x160xf32>
    %63 = arith.addf %58, %62 : vector<10x160xf32>
    %c10_62 = arith.constant 10 : index
    %c0_63 = arith.constant 0 : index
    %64 = vector.load %arg10[%c10_62, %c0_63] : memref<24x256xf32, #tpu.memory_space<vmem>>, vector<10x192xf32>
    %c2_64 = arith.constant 2 : index
    %c0_65 = arith.constant 0 : index
    %c0_66 = arith.constant 0 : index
    %65 = vector.load %arg4[%c2_64, %c0_65, %c0_66] : memref<3x192x160xf32, #tpu.memory_space<vmem>>, vector<1x192x160xf32>
    %66 = vector.shape_cast %65 : vector<1x192x160xf32> to vector<192x160xf32>
    %cst_67 = arith.constant dense<0.000000e+00> : vector<10x160xf32>
    %67 = tpu.matmul %64, %66, %cst_67 {dimension_numbers = #tpu.dot_dimension_numbers<[1], [0], [0], [1], [0, 0, 1, 1], [], []>} : vector<10x192xf32>, vector<192x160xf32>, vector<10x160xf32> -> vector<10x160xf32>
    %68 = arith.addf %63, %67 : vector<10x160xf32>
    %c4 = arith.constant 4 : index
    %c0_68 = arith.constant 0 : index
    %69 = vector.load %arg8[%c4, %c0_68] : memref<12x192xf32, #tpu.memory_space<vmem>>, vector<1x160xf32>
    %70 = vector.broadcast %69 : vector<1x160xf32> to vector<10x160xf32>
    %71 = arith.addf %68, %70 : vector<10x160xf32>
    %cst_69 = arith.constant 0.000000e+00 : f32
    %72 = vector.broadcast %cst_69 : f32 to vector<10x160xf32>
    %73 = arith.maximumf %71, %72 : vector<10x160xf32>
    %c5 = arith.constant 5 : index
    %c0_70 = arith.constant 0 : index
    %74 = vector.load %arg8[%c5, %c0_70] : memref<12x192xf32, #tpu.memory_space<vmem>>, vector<1x160xf32>
    %75 = vector.broadcast %74 : vector<1x160xf32> to vector<10x160xf32>
    %76 = arith.addf %73, %75 : vector<10x160xf32>
    %cst_71 = arith.constant 0.000000e+00 : f32
    %77 = vector.broadcast %cst_71 : f32 to vector<24x256xf32>
    %c0_72 = arith.constant 0 : index
    %c0_73 = arith.constant 0 : index
    %78 = vector.load %arg10[%c0_72, %c0_73] : memref<24x256xf32, #tpu.memory_space<vmem>>, vector<24x256xf32>
    tpu.vector_store %arg10[%c0_72, %c0_73], %77 {strides = array<i32>} : memref<24x256xf32, #tpu.memory_space<vmem>>, vector<24x256xf32>,
    %c8_74 = arith.constant 8 : index
    %c0_75 = arith.constant 0 : index
    %79 = vector.load %arg10[%c8_74, %c0_75] : memref<24x256xf32, #tpu.memory_space<vmem>>, vector<10x160xf32>
    tpu.vector_store %arg10[%c8_74, %c0_75], %76 {strides = array<i32>} : memref<24x256xf32, #tpu.memory_space<vmem>>, vector<10x160xf32>,
    %cst_76 = arith.constant 0.000000e+00 : f32
    %80 = vector.broadcast %cst_76 : f32 to vector<12x192xf32>
    %c6 = arith.constant 6 : index
    %c0_77 = arith.constant 0 : index
    %81 = vector.load %arg10[%c6, %c0_77] : memref<24x256xf32, #tpu.memory_space<vmem>>, vector<12x160xf32>
    %c0_78 = arith.constant 0 : index
    %c0_79 = arith.constant 0 : index
    %c0_80 = arith.constant 0 : index
    %82 = vector.load %arg5[%c0_78, %c0_79, %c0_80] : memref<3x160x192xf32, #tpu.memory_space<vmem>>, vector<1x160x192xf32>
    %83 = vector.shape_cast %82 : vector<1x160x192xf32> to vector<160x192xf32>
    %cst_81 = arith.constant dense<0.000000e+00> : vector<12x192xf32>
    %84 = tpu.matmul %81, %83, %cst_81 {dimension_numbers = #tpu.dot_dimension_numbers<[1], [0], [0], [1], [0, 0, 1, 1], [], []>} : vector<12x160xf32>, vector<160x192xf32>, vector<12x192xf32> -> vector<12x192xf32>
    %85 = arith.addf %80, %84 : vector<12x192xf32>
    %c7 = arith.constant 7 : index
    %c0_82 = arith.constant 0 : index
    %86 = vector.load %arg10[%c7, %c0_82] : memref<24x256xf32, #tpu.memory_space<vmem>>, vector<12x160xf32>
    %c1_83 = arith.constant 1 : index
    %c0_84 = arith.constant 0 : index
    %c0_85 = arith.constant 0 : index
    %87 = vector.load %arg5[%c1_83, %c0_84, %c0_85] : memref<3x160x192xf32, #tpu.memory_space<vmem>>, vector<1x160x192xf32>
    %88 = vector.shape_cast %87 : vector<1x160x192xf32> to vector<160x192xf32>
    %cst_86 = arith.constant dense<0.000000e+00> : vector<12x192xf32>
    %89 = tpu.matmul %86, %88, %cst_86 {dimension_numbers = #tpu.dot_dimension_numbers<[1], [0], [0], [1], [0, 0, 1, 1], [], []>} : vector<12x160xf32>, vector<160x192xf32>, vector<12x192xf32> -> vector<12x192xf32>
    %90 = arith.addf %85, %89 : vector<12x192xf32>
    %c8_87 = arith.constant 8 : index
    %c0_88 = arith.constant 0 : index
    %91 = vector.load %arg10[%c8_87, %c0_88] : memref<24x256xf32, #tpu.memory_space<vmem>>, vector<12x160xf32>
    %c2_89 = arith.constant 2 : index
    %c0_90 = arith.constant 0 : index
    %c0_91 = arith.constant 0 : index
    %92 = vector.load %arg5[%c2_89, %c0_90, %c0_91] : memref<3x160x192xf32, #tpu.memory_space<vmem>>, vector<1x160x192xf32>
    %93 = vector.shape_cast %92 : vector<1x160x192xf32> to vector<160x192xf32>
    %cst_92 = arith.constant dense<0.000000e+00> : vector<12x192xf32>
    %94 = tpu.matmul %91, %93, %cst_92 {dimension_numbers = #tpu.dot_dimension_numbers<[1], [0], [0], [1], [0, 0, 1, 1], [], []>} : vector<12x160xf32>, vector<160x192xf32>, vector<12x192xf32> -> vector<12x192xf32>
    %95 = arith.addf %90, %94 : vector<12x192xf32>
    %c6_93 = arith.constant 6 : index
    %c0_94 = arith.constant 0 : index
    %96 = vector.load %arg8[%c6_93, %c0_94] : memref<12x192xf32, #tpu.memory_space<vmem>>, vector<1x192xf32>
    %97 = vector.broadcast %96 : vector<1x192xf32> to vector<12x192xf32>
    %98 = arith.addf %95, %97 : vector<12x192xf32>
    %cst_95 = arith.constant 0.000000e+00 : f32
    %99 = vector.broadcast %cst_95 : f32 to vector<12x192xf32>
    %100 = arith.maximumf %98, %99 : vector<12x192xf32>
    %c7_96 = arith.constant 7 : index
    %c0_97 = arith.constant 0 : index
    %101 = vector.load %arg8[%c7_96, %c0_97] : memref<12x192xf32, #tpu.memory_space<vmem>>, vector<1x192xf32>
    %102 = vector.broadcast %101 : vector<1x192xf32> to vector<12x192xf32>
    %103 = arith.addf %100, %102 : vector<12x192xf32>
    %cst_98 = arith.constant 0.000000e+00 : f32
    %104 = vector.broadcast %cst_98 : f32 to vector<24x256xf32>
    %c0_99 = arith.constant 0 : index
    %c0_100 = arith.constant 0 : index
    %105 = vector.load %arg10[%c0_99, %c0_100] : memref<24x256xf32, #tpu.memory_space<vmem>>, vector<24x256xf32>
    tpu.vector_store %arg10[%c0_99, %c0_100], %104 {strides = array<i32>} : memref<24x256xf32, #tpu.memory_space<vmem>>, vector<24x256xf32>,
    %c8_101 = arith.constant 8 : index
    %c0_102 = arith.constant 0 : index
    %106 = vector.load %arg10[%c8_101, %c0_102] : memref<24x256xf32, #tpu.memory_space<vmem>>, vector<12x192xf32>
    tpu.vector_store %arg10[%c8_101, %c0_102], %103 {strides = array<i32>} : memref<24x256xf32, #tpu.memory_space<vmem>>, vector<12x192xf32>,
    %cst_103 = arith.constant 0.000000e+00 : f32
    %107 = vector.broadcast %cst_103 : f32 to vector<14x112xf32>
    %c6_104 = arith.constant 6 : index
    %c0_105 = arith.constant 0 : index
    %108 = vector.load %arg10[%c6_104, %c0_105] : memref<24x256xf32, #tpu.memory_space<vmem>>, vector<14x192xf32>
    %c0_106 = arith.constant 0 : index
    %c0_107 = arith.constant 0 : index
    %c0_108 = arith.constant 0 : index
    %109 = vector.load %arg6[%c0_106, %c0_107, %c0_108] : memref<3x192x112xf32, #tpu.memory_space<vmem>>, vector<1x192x112xf32>
    %110 = vector.shape_cast %109 : vector<1x192x112xf32> to vector<192x112xf32>
    %cst_109 = arith.constant dense<0.000000e+00> : vector<14x112xf32>
    %111 = tpu.matmul %108, %110, %cst_109 {dimension_numbers = #tpu.dot_dimension_numbers<[1], [0], [0], [1], [0, 0, 1, 1], [], []>} : vector<14x192xf32>, vector<192x112xf32>, vector<14x112xf32> -> vector<14x112xf32>
    %112 = arith.addf %107, %111 : vector<14x112xf32>
    %c7_110 = arith.constant 7 : index
    %c0_111 = arith.constant 0 : index
    %113 = vector.load %arg10[%c7_110, %c0_111] : memref<24x256xf32, #tpu.memory_space<vmem>>, vector<14x192xf32>
    %c1_112 = arith.constant 1 : index
    %c0_113 = arith.constant 0 : index
    %c0_114 = arith.constant 0 : index
    %114 = vector.load %arg6[%c1_112, %c0_113, %c0_114] : memref<3x192x112xf32, #tpu.memory_space<vmem>>, vector<1x192x112xf32>
    %115 = vector.shape_cast %114 : vector<1x192x112xf32> to vector<192x112xf32>
    %cst_115 = arith.constant dense<0.000000e+00> : vector<14x112xf32>
    %116 = tpu.matmul %113, %115, %cst_115 {dimension_numbers = #tpu.dot_dimension_numbers<[1], [0], [0], [1], [0, 0, 1, 1], [], []>} : vector<14x192xf32>, vector<192x112xf32>, vector<14x112xf32> -> vector<14x112xf32>
    %117 = arith.addf %112, %116 : vector<14x112xf32>
    %c8_116 = arith.constant 8 : index
    %c0_117 = arith.constant 0 : index
    %118 = vector.load %arg10[%c8_116, %c0_117] : memref<24x256xf32, #tpu.memory_space<vmem>>, vector<14x192xf32>
    %c2_118 = arith.constant 2 : index
    %c0_119 = arith.constant 0 : index
    %c0_120 = arith.constant 0 : index
    %119 = vector.load %arg6[%c2_118, %c0_119, %c0_120] : memref<3x192x112xf32, #tpu.memory_space<vmem>>, vector<1x192x112xf32>
    %120 = vector.shape_cast %119 : vector<1x192x112xf32> to vector<192x112xf32>
    %cst_121 = arith.constant dense<0.000000e+00> : vector<14x112xf32>
    %121 = tpu.matmul %118, %120, %cst_121 {dimension_numbers = #tpu.dot_dimension_numbers<[1], [0], [0], [1], [0, 0, 1, 1], [], []>} : vector<14x192xf32>, vector<192x112xf32>, vector<14x112xf32> -> vector<14x112xf32>
    %122 = arith.addf %117, %121 : vector<14x112xf32>
    %c8_122 = arith.constant 8 : index
    %c0_123 = arith.constant 0 : index
    %123 = vector.load %arg8[%c8_122, %c0_123] : memref<12x192xf32, #tpu.memory_space<vmem>>, vector<1x112xf32>
    %124 = vector.broadcast %123 : vector<1x112xf32> to vector<14x112xf32>
    %125 = arith.addf %122, %124 : vector<14x112xf32>
    %cst_124 = arith.constant 0.000000e+00 : f32
    %126 = vector.broadcast %cst_124 : f32 to vector<14x112xf32>
    %127 = arith.maximumf %125, %126 : vector<14x112xf32>
    %c9_125 = arith.constant 9 : index
    %c0_126 = arith.constant 0 : index
    %128 = vector.load %arg8[%c9_125, %c0_126] : memref<12x192xf32, #tpu.memory_space<vmem>>, vector<1x112xf32>
    %129 = vector.broadcast %128 : vector<1x112xf32> to vector<14x112xf32>
    %130 = arith.addf %127, %129 : vector<14x112xf32>
    %cst_127 = arith.constant 0.000000e+00 : f32
    %131 = vector.broadcast %cst_127 : f32 to vector<24x256xf32>
    %c0_128 = arith.constant 0 : index
    %c0_129 = arith.constant 0 : index
    %132 = vector.load %arg10[%c0_128, %c0_129] : memref<24x256xf32, #tpu.memory_space<vmem>>, vector<24x256xf32>
    tpu.vector_store %arg10[%c0_128, %c0_129], %131 {strides = array<i32>} : memref<24x256xf32, #tpu.memory_space<vmem>>, vector<24x256xf32>,
    %c8_130 = arith.constant 8 : index
    %c0_131 = arith.constant 0 : index
    %133 = vector.load %arg10[%c8_130, %c0_131] : memref<24x256xf32, #tpu.memory_space<vmem>>, vector<14x112xf32>
    tpu.vector_store %arg10[%c8_130, %c0_131], %130 {strides = array<i32>} : memref<24x256xf32, #tpu.memory_space<vmem>>, vector<14x112xf32>,
    %cst_132 = arith.constant 0.000000e+00 : f32
    %134 = vector.broadcast %cst_132 : f32 to vector<16x16xf32>
    %c6_133 = arith.constant 6 : index
    %c0_134 = arith.constant 0 : index
    %135 = vector.load %arg10[%c6_133, %c0_134] : memref<24x256xf32, #tpu.memory_space<vmem>>, vector<16x112xf32>
    %c0_135 = arith.constant 0 : index
    %c0_136 = arith.constant 0 : index
    %c0_137 = arith.constant 0 : index
    %136 = vector.load %arg7[%c0_135, %c0_136, %c0_137] : memref<3x112x16xf32, #tpu.memory_space<vmem>>, vector<1x112x16xf32>
    %137 = vector.shape_cast %136 : vector<1x112x16xf32> to vector<112x16xf32>
    %cst_138 = arith.constant dense<0.000000e+00> : vector<16x16xf32>
    %138 = tpu.matmul %135, %137, %cst_138 {dimension_numbers = #tpu.dot_dimension_numbers<[1], [0], [0], [1], [0, 0, 1, 1], [], []>} : vector<16x112xf32>, vector<112x16xf32>, vector<16x16xf32> -> vector<16x16xf32>
    %139 = arith.addf %134, %138 : vector<16x16xf32>
    %c7_139 = arith.constant 7 : index
    %c0_140 = arith.constant 0 : index
    %140 = vector.load %arg10[%c7_139, %c0_140] : memref<24x256xf32, #tpu.memory_space<vmem>>, vector<16x112xf32>
    %c1_141 = arith.constant 1 : index
    %c0_142 = arith.constant 0 : index
    %c0_143 = arith.constant 0 : index
    %141 = vector.load %arg7[%c1_141, %c0_142, %c0_143] : memref<3x112x16xf32, #tpu.memory_space<vmem>>, vector<1x112x16xf32>
    %142 = vector.shape_cast %141 : vector<1x112x16xf32> to vector<112x16xf32>
    %cst_144 = arith.constant dense<0.000000e+00> : vector<16x16xf32>
    %143 = tpu.matmul %140, %142, %cst_144 {dimension_numbers = #tpu.dot_dimension_numbers<[1], [0], [0], [1], [0, 0, 1, 1], [], []>} : vector<16x112xf32>, vector<112x16xf32>, vector<16x16xf32> -> vector<16x16xf32>
    %144 = arith.addf %139, %143 : vector<16x16xf32>
    %c8_145 = arith.constant 8 : index
    %c0_146 = arith.constant 0 : index
    %145 = vector.load %arg10[%c8_145, %c0_146] : memref<24x256xf32, #tpu.memory_space<vmem>>, vector<16x112xf32>
    %c2_147 = arith.constant 2 : index
    %c0_148 = arith.constant 0 : index
    %c0_149 = arith.constant 0 : index
    %146 = vector.load %arg7[%c2_147, %c0_148, %c0_149] : memref<3x112x16xf32, #tpu.memory_space<vmem>>, vector<1x112x16xf32>
    %147 = vector.shape_cast %146 : vector<1x112x16xf32> to vector<112x16xf32>
    %cst_150 = arith.constant dense<0.000000e+00> : vector<16x16xf32>
    %148 = tpu.matmul %145, %147, %cst_150 {dimension_numbers = #tpu.dot_dimension_numbers<[1], [0], [0], [1], [0, 0, 1, 1], [], []>} : vector<16x112xf32>, vector<112x16xf32>, vector<16x16xf32> -> vector<16x16xf32>
    %149 = arith.addf %144, %148 : vector<16x16xf32>
    %c10_151 = arith.constant 10 : index
    %c0_152 = arith.constant 0 : index
    %150 = vector.load %arg8[%c10_151, %c0_152] : memref<12x192xf32, #tpu.memory_space<vmem>>, vector<1x16xf32>
    %151 = vector.broadcast %150 : vector<1x16xf32> to vector<16x16xf32>
    %152 = arith.addf %149, %151 : vector<16x16xf32>
    %c0_153 = arith.constant 0 : index
    %c0_154 = arith.constant 0 : index
    %c0_155 = arith.constant 0 : index
    %153 = vector.load %arg9[%c0_153, %c0_154, %c0_155] : memref<1x16x16xf32, #tpu.memory_space<vmem>>, vector<1x16x16xf32>
    %154 = vector.shape_cast %153 : vector<1x16x16xf32> to vector<16x16xf32>
    %155 = vector.shape_cast %152 : vector<16x16xf32> to vector<1x16x16xf32>
    tpu.vector_store %arg9[%c0_153, %c0_154, %c0_155], %155 {strides = array<i32>} : memref<1x16x16xf32, #tpu.memory_space<vmem>>, vector<1x16x16xf32>,
    return
  }
  func.func @transform_0(%arg0: i32) -> (i32, i32, i32) {
    %c0_i32 = arith.constant 0 : i32
    %c0_i32_0 = arith.constant 0 : i32
    %c0_i32_1 = arith.constant 0 : i32
    return %arg0, %c0_i32, %c0_i32_0 : i32, i32, i32
  }
  func.func @transform_1(%arg0: i32) -> (i32, i32, i32) {
    %c0_i32 = arith.constant 0 : i32
    %c0_i32_0 = arith.constant 0 : i32
    %c0_i32_1 = arith.constant 0 : i32
    %c0_i32_2 = arith.constant 0 : i32
    return %c0_i32, %c0_i32_0, %c0_i32_1 : i32, i32, i32
  }
  func.func @transform_2(%arg0: i32) -> (i32, i32, i32) {
    %c0_i32 = arith.constant 0 : i32
    %c0_i32_0 = arith.constant 0 : i32
    %c0_i32_1 = arith.constant 0 : i32
    %c0_i32_2 = arith.constant 0 : i32
    return %c0_i32, %c0_i32_0, %c0_i32_1 : i32, i32, i32
  }
  func.func @transform_3(%arg0: i32) -> (i32, i32, i32) {
    %c0_i32 = arith.constant 0 : i32
    %c0_i32_0 = arith.constant 0 : i32
    %c0_i32_1 = arith.constant 0 : i32
    %c0_i32_2 = arith.constant 0 : i32
    return %c0_i32, %c0_i32_0, %c0_i32_1 : i32, i32, i32
  }
  func.func @transform_4(%arg0: i32) -> (i32, i32, i32) {
    %c0_i32 = arith.constant 0 : i32
    %c0_i32_0 = arith.constant 0 : i32
    %c0_i32_1 = arith.constant 0 : i32
    %c0_i32_2 = arith.constant 0 : i32
    return %c0_i32, %c0_i32_0, %c0_i32_1 : i32, i32, i32
  }
  func.func @transform_5(%arg0: i32) -> (i32, i32, i32) {
    %c0_i32 = arith.constant 0 : i32
    %c0_i32_0 = arith.constant 0 : i32
    %c0_i32_1 = arith.constant 0 : i32
    %c0_i32_2 = arith.constant 0 : i32
    return %c0_i32, %c0_i32_0, %c0_i32_1 : i32, i32, i32
  }
  func.func @transform_6(%arg0: i32) -> (i32, i32, i32) {
    %c0_i32 = arith.constant 0 : i32
    %c0_i32_0 = arith.constant 0 : i32
    %c0_i32_1 = arith.constant 0 : i32
    %c0_i32_2 = arith.constant 0 : i32
    return %c0_i32, %c0_i32_0, %c0_i32_1 : i32, i32, i32
  }
  func.func @transform_7(%arg0: i32) -> (i32, i32) {
    %c0_i32 = arith.constant 0 : i32
    %c0_i32_0 = arith.constant 0 : i32
    %c0_i32_1 = arith.constant 0 : i32
    return %c0_i32, %c0_i32_0 : i32, i32
  }
  func.func @transform_8(%arg0: i32) -> (i32, i32, i32) {
    %c0_i32 = arith.constant 0 : i32
    %c0_i32_0 = arith.constant 0 : i32
    %c0_i32_1 = arith.constant 0 : i32
    return %arg0, %c0_i32, %c0_i32_0 : i32, i32, i32
  }
}

</mosaic_0001>

<bundles_post_ra>
// kernel: tile.58
= control target key start
LH: loop header
LB: loop body
LE: loop exit
PB: predicated region body
PF: predicated region fallthrough
CT: control target
= control target key end

     0   :  { %s28_s0 = inlined_call_operand.vmem [shape: f32[8], index: 0, kind: input, shape index: {}]   ;;  %s29_s1 = inlined_call_operand.vmem [shape: f32[14,8], index: 1, kind: output, shape index: {}]  }
   0x1   :  { %v4_v0 = vld [vmem:[%s28_s0] ss:$0 sm:$0xff] }
   0x2   :  { %5 = vst [vmem:[%s29_s1] sm:$0xff] %v4_v0  ;;  %8 = vst [vmem:[%s29_s1 + $0x8] sm:$0xff] %v4_v0 }

// kernel: tile.68
= control target key start
LH: loop header
LB: loop body
LE: loop exit
PB: predicated region body
PF: predicated region fallthrough
CT: control target
= control target key end

     0   :  { %s28_s0 = inlined_call_operand.vmem [shape: f32[16], index: 0, kind: input, shape index: {}]   ;;  %s29_s1 = inlined_call_operand.vmem [shape: f32[12,16], index: 1, kind: output, shape index: {}]  }
   0x1   :  { %v4_v0 = vld [vmem:[%s28_s0] ss:$0 sm:$0xff] }
   0x2   :  { %5 = vst [vmem:[%s29_s1] sm:$0xff] %v4_v0  ;;  %8 = vst [vmem:[%s29_s1 + $0x8] sm:$0xff] %v4_v0 }

// kernel: tile.78
= control target key start
LH: loop header
LB: loop body
LE: loop exit
PB: predicated region body
PF: predicated region fallthrough
CT: control target
= control target key end

     0   :  { %s28_s0 = inlined_call_operand.vmem [shape: f32[16], index: 0, kind: input, shape index: {}]   ;;  %s29_s1 = inlined_call_operand.vmem [shape: f32[10,16], index: 1, kind: output, shape index: {}]  }
   0x1   :  { %v4_v0 = vld [vmem:[%s28_s0] ss:$0 sm:$0xff] }
   0x2   :  { %5 = vst [vmem:[%s29_s1] sm:$0xff] %v4_v0  ;;  %8 = vst [vmem:[%s29_s1 + $0x8] sm:$0xff] %v4_v0 }

// kernel: prob_lightweight_forward.1
= control target key start
LH: loop header
LB: loop body
LE: loop exit
PB: predicated region body
PF: predicated region fallthrough
CT: control target
= control target key end

     0   :  { %13 = vsyncpa [#allocation4], 0  ;;  %s5859_s0 = inlined_call_operand.vmem [shape: f32[2,16,48], index: 0, kind: input, shape index: {}]   ;;  %s5860_s1 = inlined_call_operand.vmem [shape: f32[3,48,112], index: 1, kind: input, shape index: {}]   ;;  %s5861_s2 = inlined_call_operand.vmem [shape: f32[3,112,192], index: 2, kind: input, shape index: {}]   ;;  %s5862_s3 = inlined_call_operand.vmem [shape: f32[3,192,160], index: 3, kind: input, shape index: {}]   ;;  %s5863_s4 = inlined_call_operand.vmem [shape: f32[3,160,192], index: 4, kind: input, shape index: {}]   ;;  %s5864_s5 = inlined_call_operand.vmem [shape: f32[3,192,112], index: 5, kind: input, shape index: {}]   ;;  %s5865_s6 = inlined_call_operand.vmem [shape: f32[3,112,16], index: 6, kind: input, shape index: {}]   ;;  %s5866_s7 = inlined_call_operand.vmem [shape: f32[12,192], index: 7, kind: input, shape index: {}]   ;;  %s5867_s8 = inlined_call_operand.hbm [shape: f32[2,16,16], index: 8, kind: output, shape index: {}]  }
   0x1   :  { %15 = vsyncpa [#allocation4 + $0x1], 0  ;;  %s4057_s27 = smov 0   ;;  %s4059_s28 = smov 0  }
   0x2   :  { %s4061_s29 = smov 0   ;;  %s4063_s30 = smov 0  }
   0x3 LB: > { %s4078_s9 = sadd.s32 4294967295, %s4005_s30   ;;  %s2705_s10 = sadd.s32 4294967294, %s4005_s30   ;;  %s4005_s30 = sphi %s4063_s30, %s5873_s30   ;;  %s4001_s29 = sphi %s4061_s29, %s5872_s29   ;;  %s3997_s28 = sphi %s4059_s28, %s5871_s28   ;;  %s3993_s27 = sphi %s4057_s27, %s5870_s27  }
   0x4   : > { %s4082_s11 = sadd.s32 1, %s4005_s30   ;;  %s201_s12 = sadd.s32 1, %s4001_s29 }
   0x5   : > { %s198_s13 = ssub.s32 %s4005_s30, %s4082_s11  ;;  %p211_p0 = scmp.ne.s32.totalorder %s4001_s29, %s3997_s28 }
   0x6   : > { %p199_p1 = scmp.eq.s32.totalorder %s198_s13, 0  ;;  %p212_p2 = scmp.eq.s32.totalorder %s4078_s9, 1 }
   0x7   : > { %p217_p3 = scmp.ne.s32.totalorder %s3997_s28, %s3993_s27  ;;  %p218_p4 = scmp.eq.s32.totalorder %s2705_s10, 1 }
   0x8   : > { %s4093_s14 = scalar_select %p199_p1, %s4001_s29, %s201_s12  }
   0x9   : > { %p4095_p5 = por %p212_p2, %p211_p0  ;;  %p4099_p6 = por %p218_p4, %p217_p3 }
   0xa   : > { %p2708_p7 = scmp.ge.s32.totalorder %s4005_s30, 1  ;;  %p265_p8 = scmp.lt.s32.totalorder %s4005_s30, 3 }
   0xc   : > { %p266_p9 = pnand %p2708_p7, %p265_p8 }
   0xd   : > { %v2712_v0 = vld [vmem:[%s5860_s1 + $0x30] sm:$0xff] (!%p266_p9)  ;;  %v2713_v1 = vld [vmem:[%s5860_s1 + $0x38] sm:$0xff] (!%p266_p9)  ;;  %v2714_v2 = vld [vmem:[%s5860_s1 + $0x40] sm:$0xff] (!%p266_p9)  ;;  %p299_p10 = scmp.lt.s32.totalorder (!%p266_p9), %s4078_s9, 1  ;;  %vm306_vm0 = vcmask (!%p266_p9), 392192   ;;  %vm328_vm1 = vcmask (!%p266_p9), 1046528  }
   0xe   : > { %269 = sbr.rel (%p266_p9) target bundleno = 1761 (0x6e1), region = 52  ;;  %v3291_v3 = vpack.c.bf16 (!%p266_p9), %v2713_v1, %v2712_v0  ;;  %v2715_v4 = vld [vmem:[%s5860_s1 + $0x48] sm:$0xff] (!%p266_p9)  ;;  %v2716_v6 = vld [vmem:[%s5860_s1 + $0x50] sm:$0xff] (!%p266_p9)  ;;  %v2717_v7 = vld [vmem:[%s5860_s1 + $0x58] sm:$0xff] (!%p266_p9)  ;;  %vm503_vm2 = vcmask (!%p266_p9), 1045504   ;;  %vm598_vm3 = vcmask (!%p266_p9), 914432  }
   0xf   : > { %v3295_v5 = vpack.c.bf16 (!%p266_p9), %v2715_v4, %v2714_v2  ;;  %v3299_v8 = vpack.c.bf16 (!%p266_p9), %v2717_v7, %v2716_v6  ;;  %v311_v9 = vld [vmem:[%s5860_s1] sm:$0xff] (!%p266_p9)  ;;  %v312_v10 = vld [vmem:[%s5860_s1 + $0x8] sm:$0xff] (!%p266_p9)  ;;  %v605_v14 = vld [vmem:[%s5861_s2 + $0x18] sm:$0xff] (!%p266_p9)  ;;  %vm596_vm4 = vcmask (!%p266_p9), 916480   ;;  %vm990_vm5 = vcmask (!%p266_p9), 523264   ;;  %s296_s10 = sand.u32 (!%p266_p9), 1, %s3997_s28  }
  0x10   : > { %3292 = vmatprep.subr.bf16.mxu0 (!%p266_p9), %v3291_v3  ;;  %v603_v13 = vld [vmem:[%s5861_s2 + $0x8] sm:$0xff] (!%p266_p9)  ;;  %v602_v15 = vld [vmem:[%s5861_s2] sm:$0xff] (!%p266_p9)  ;;  %v604_v16 = vld [vmem:[%s5861_s2 + $0x10] sm:$0xff] (!%p266_p9)  ;;  %v3303_v20 = vpack.c.bf16 (!%p266_p9), %v312_v10, %v311_v9  ;;  %vm993_vm6 = vcmask (!%p266_p9), 519168   ;;  %vm1471_vm7 = vcmask (!%p266_p9), 261120   ;;  %vm1474_vm8 = vcmask (!%p266_p9), 254976  }
  0x11   : > { %3294 = vmatpush3.bf16.msra.mxu0 (!%p266_p9), %v3291_v3  ;;  %v3355_v17 = vpack.c.bf16 (!%p266_p9), %v605_v14, %v603_v13  ;;  %v3357_v18 = vpack.c.bf16 (!%p266_p9), %v604_v16, %v602_v15  ;;  %v607_v19 = vld [vmem:[%s5861_s2 + $0x28] sm:$0xff] (!%p266_p9)  ;;  %v609_v21 = vld [vmem:[%s5861_s2 + $0x38] sm:$0xff] (!%p266_p9)  ;;  %v606_v23 = vld [vmem:[%s5861_s2 + $0x20] sm:$0xff] (!%p266_p9)  ;;  %vm1573_vm9 = vcmask (!%p266_p9), 1040384   ;;  %vm1671_vm10 = vcmask (!%p266_p9), 1041408   ;;  %s2709_s12 = sshll.u32 (!%p266_p9), %s296_s10, 4 }
  0x12   : > { %3296 = vmatprep.subr.bf16.mxu0 (!%p266_p9), %v3295_v5  ;;  %v3359_v22 = vpack.c.bf16 (!%p266_p9), %v609_v21, %v607_v19  ;;  %v608_v24 = vld [vmem:[%s5861_s2 + $0x30] sm:$0xff] (!%p266_p9)  ;;  %v611_v26 = vld [vmem:[%s5861_s2 + $0x48] sm:$0xff] (!%p266_p9)  ;;  %v613_v27 = vld [vmem:[%s5861_s2 + $0x58] sm:$0xff] (!%p266_p9)  ;;  %s298_s18 = scalar_lea.vmem (!%p266_p9), [#allocation3], %s2709_s12  ;;  %vm2626_vm11 = vcmask (!%p266_p9), 130048   ;;  %s5818_s24 = scalar_lea.sflag (!%p266_p9), [#allocation4], %s296_s10 }
  0x13   : > { %3356 = vmatprep.subr.bf16.mxu1 (!%p266_p9), %v3355_v17  ;;  %v3361_v25 = vpack.c.bf16 (!%p266_p9), %v608_v24, %v606_v23  ;;  %v3363_v28 = vpack.c.bf16 (!%p266_p9), %v613_v27, %v611_v26  ;;  %v610_v29 = vld [vmem:[%s5861_s2 + $0x40] sm:$0xff] (!%p266_p9)  ;;  %v313_v30 = vld [vmem:[%s5860_s1 + $0x10] sm:$0xff] (!%p266_p9)  ;;  %v314_v34 = vld [vmem:[%s5860_s1 + $0x18] sm:$0xff] (!%p266_p9)  ;;  %s2643_s19 = sshll.u32 (!%p266_p9), %s298_s18, 4  ;;  %s4009_s25 = smov (!%p266_p9), [#allocation3]   ;;  %s5811_s19 = int_to_ptr.vmem [resolvable:$true] %s2643_s19 }
  0x14   : > { %3358 = vmatpush1.bf16.msra.mxu1 (!%p266_p9), %v3357_v18  ;;  %v612_v31 = vld [vmem:[%s5861_s2 + $0x50] sm:$0xff] (!%p266_p9)  ;;  %v615_v38 = vld [vmem:[%s5861_s2 + $0x68] sm:$0xff] (!%p266_p9)  ;;  %v617_v39 = vld [vmem:[%s5861_s2 + $0x78] sm:$0xff] (!%p266_p9)  ;;  %v3307_v41 = vpack.c.bf16 (!%p266_p9), %v314_v34, %v313_v30  ;;  %s3947_s26 = sshll.u32 (!%p266_p9), %s4009_s25, 4  ;;  %s3948_s26 = int_to_ptr.vmem [resolvable:$false] %s3947_s26 }
  0x15   : > { %s300_s13 = scalar_select %p299_p10, %s4078_s9, 1  ;;  %3298 = vmatpush3.bf16.msra.mxu0 %v3295_v5  ;;  %3360 = vmatprep.subr.bf16.mxu1 %v3359_v22  ;;  %v3365_v37 = vpack.c.bf16 %v612_v31, %v610_v29  ;;  %v3367_v43 = vpack.c.bf16 %v617_v39, %v615_v38  ;;  %v315_v44 = vld [vmem:[%s5860_s1 + $0x20] sm:$0xff]  ;;  %v316_v45 = vld [vmem:[%s5860_s1 + $0x28] sm:$0xff]  ;;  %v2724_v54 = vld [vmem:[%s5860_s1 + $0x70] sm:$0xff] }
  0x16   : > { %3300 = vmatprep.subr.bf16.mxu0 %v3299_v8  ;;  %v3311_v46 = vpack.c.bf16 %v316_v45, %v315_v44  ;;  %v2722_v47 = vld [vmem:[%s5860_s1 + $0x60] sm:$0xff]  ;;  %v2723_v48 = vld [vmem:[%s5860_s1 + $0x68] sm:$0xff]  ;;  %v2725_v55 = vld [vmem:[%s5860_s1 + $0x78] sm:$0xff]  ;;  %s3949_s12 = scalar_lea.vmem %s3948_s26, 512  ;;  %p3950_p0 = scmp.lt.s32.totalorder %s5811_s19, %s3948_s26 }
  0x17   : > { %s3079_s17 = sshll.u32 %s300_s13, 4  ;;  %v3315_v51 = vpack.c.bf16 %v2723_v48, %v2722_v47  ;;  %v3319_v57 = vpack.c.bf16 %v2725_v55, %v2724_v54  ;;  %v2726_v59 = vld [vmem:[%s5860_s1 + $0x80] sm:$0xff]  ;;  %v2727_v60 = vld [vmem:[%s5860_s1 + $0x88] sm:$0xff]  ;;  %v2733_v63 = vld [vmem:[%s5861_s2 + $0xf8] sm:$0xff] }
  0x18   : > { %s303_s20 = scalar_lea.vmem %s5859_s0, %s3079_s17  ;;  %3362 = vmatpush1.bf16.msra.mxu1 %v3361_v25  ;;  %v3323_v61 = vpack.c.bf16 %v2727_v60, %v2726_v59  ;;  %v2731_v62 = vld [vmem:[%s5861_s2 + $0xe8] sm:$0xff]  ;;  %v2730_v1 = vld [vmem:[%s5861_s2 + $0xe0] sm:$0xff]  ;;  %v2732_v2 = vld [vmem:[%s5861_s2 + $0xf0] sm:$0xff] }
  0x19   : > { %v304_v11 = vld [vmem:[%s303_s20] sm:$0xff]  ;;  %v305_v12 = vld [vmem:[%s303_s20 + $0x8] sm:$0xff]  ;;  %3302 = vmatpush3.bf16.msra.mxu0 %v3299_v8  ;;  %3364 = vmatprep.subr.bf16.mxu1 %v3363_v28  ;;  %v3327_v0 = vpack.c.bf16 %v2733_v63, %v2731_v62  ;;  %v2737_v4 = vld [vmem:[%s5861_s2 + $0x118] sm:$0xff]  ;;  %v3329_v5 = vpack.c.bf16 %v2732_v2, %v2730_v1  ;;  %s3080_s20 = sshll.u32 %s4078_s9, 8  ;;  %s3943_s9 = scalar_lea.vmem %s5811_s19, 256 }
  0x1a   : > { %307 = vst.msk [vmem:[#allocation2 + $0x10] sm:$0xff] %vm306_vm0, %v304_v11  ;;  %308 = vst.msk [vmem:[#allocation2 + $0x20] sm:$0xff] %vm306_vm0, %v305_v12  ;;  %3304 = vmatprep.subr.bf16.mxu0 %v3303_v20  ;;  %v2735_v3 = vld [vmem:[%s5861_s2 + $0x108] sm:$0xff]  ;;  %v2734_v7 = vld [vmem:[%s5861_s2 + $0x100] sm:$0xff]  ;;  %s5816_s23 = scalar_lea.hbm %s5867_s8, %s3080_s20  ;;  %p3944_p11 = scmp.ne.s32.totalorder %s5811_s19, %s3943_s9 }
  0x1b   : > { %v3331_v6 = vpack.c.bf16 %v2737_v4, %v2735_v3  ;;  %v2736_v8 = vld [vmem:[%s5861_s2 + $0x110] sm:$0xff]  ;;  %v2739_v9 = vld [vmem:[%s5861_s2 + $0x128] sm:$0xff]  ;;  %v2741_v10 = vld [vmem:[%s5861_s2 + $0x138] sm:$0xff]  ;;  %p3951_p1 = scmp.lt.s32.totalorder %s3949_s12, %s3943_s9 }
  0x1c   : > { %3366 = vmatpush1.bf16.msra.mxu1 %v3365_v37  ;;  %v3333_v11 = vpack.c.bf16 %v2736_v8, %v2734_v7  ;;  %v3335_v12 = vpack.c.bf16 %v2741_v10, %v2739_v9  ;;  %v2738_v13 = vld [vmem:[%s5861_s2 + $0x120] sm:$0xff]  ;;  %v2740_v14 = vld [vmem:[%s5861_s2 + $0x130] sm:$0xff]  ;;  %v2743_v19 = vld [vmem:[%s5861_s2 + $0x148] sm:$0xff]  ;;  %p3945_p12 = pnand %p3944_p11, %p4095_p5 }
  0x1d   : > { %3368 = vmatprep.subr.bf16.mxu1 %v3367_v43  ;;  %v614_v15 = vld [vmem:[%s5861_s2 + $0x60] sm:$0xff]  ;;  %v3337_v16 = vpack.c.bf16 %v2740_v14, %v2738_v13  ;;  %v616_v17 = vld [vmem:[%s5861_s2 + $0x70] sm:$0xff]  ;;  %v619_v22 = vld [vmem:[%s5861_s2 + $0x88] sm:$0xff]  ;;  %p3952_p2 = por %p3951_p1, %p3950_p0 }
  0x1e   : > { %v3369_v18 = vpack.c.bf16 %v616_v17, %v614_v15  ;;  %v621_v23 = vld [vmem:[%s5861_s2 + $0x98] sm:$0xff]  ;;  %v2742_v24 = vld [vmem:[%s5861_s2 + $0x140] sm:$0xff]  ;;  %v2744_v26 = vld [vmem:[%s5861_s2 + $0x150] sm:$0xff]  ;;  %p3946_p13 = pneg %p3945_p12 }
  0x1f   : > { %v3371_v25 = vpack.c.bf16 %v621_v23, %v619_v22  ;;  %v618_v27 = vld [vmem:[%s5861_s2 + $0x80] sm:$0xff]  ;;  %v620_v28 = vld [vmem:[%s5861_s2 + $0x90] sm:$0xff]  ;;  %v3341_v29 = vpack.c.bf16 %v2744_v26, %v2742_v24  ;;  %v2747_v31 = vld [vmem:[%s5861_s2 + $0x168] sm:$0xff] }
  0x20   : > { %3370 = vmatpush1.bf16.msra.mxu1 %v3369_v18  ;;  %v3373_v30 = vpack.c.bf16 %v620_v28, %v618_v27  ;;  %v2748_v37 = vld [vmem:[%s5861_s2 + $0x170] sm:$0xff]  ;;  %v2751_v43 = vld [vmem:[%s5861_s2 + $0x188] sm:$0xff]  ;;  %v2753_v44 = vld [vmem:[%s5861_s2 + $0x198] sm:$0xff]  ;;  %p3953_p3 = pnand %p3952_p2, %p3946_p13 }
  0x21   : > { %v317_v32 = vld [vmem:[#allocation2 + $0x10] sm:$0xfe]  ;;  %v318_v33 = vld [vmem:[#allocation2 + $0x20] sm:$0x7f]  ;;  %3372 = vmatprep.subr.bf16.mxu1 %v3371_v25  ;;  %v627_v45 = vld [vmem:[%s5861_s2 + $0xc8] sm:$0xff] }
  0x22   : > { %v329_v35 = vrot.slane %v317_v32, 1  ;;  %v330_v36 = vrot.slane %v318_v33, 1  ;;  %v309_v42 = vld [vmem:[#allocation2 + $0x10] sm:$0xff]  ;;  %v493_v50 = vld [vmem:[#allocation2 + $0x20] sm:$0xff]  ;;  %v2749_v32 = vld [vmem:[%s5861_s2 + $0x178] sm:$0xff] }
  0x23   : > { %v492_v49 = vld [vmem:[#allocation2 + $0x10] sm:$0xfc]  ;;  %v505_v53 = vrot.slane %v493_v50, 2  ;;  %v310_v56 = vld [vmem:[#allocation2 + $0x20] sm:$0x3f]  ;;  %v623_v33 = vld [vmem:[%s5861_s2 + $0xa8] sm:$0xff]  ;;  %v3343_v34 = vpack.c.bf16 %v2749_v32, %v2747_v31 }
  0x24   : > { %v331_v40 = vsel %vm328_vm1, %v329_v35, %v330_v36  ;;  %v504_v52 = vrot.slane %v492_v49, 2  ;;  %3374 = vmatpush1.bf16.msra.mxu1 %v3373_v30  ;;  %v625_v35 = vld [vmem:[%s5861_s2 + $0xb8] sm:$0xff]  ;;  %v2750_v48 = vld [vmem:[%s5861_s2 + $0x180] sm:$0xff]  ;;  %v2752_v49 = vld [vmem:[%s5861_s2 + $0x190] sm:$0xff]  ;;  %v4007_v50 = vmov 0.0  }
  0x25   : > { %3165 = vmatprep.mubr.msk.f32.mxu0 %vm306_vm0, %v331_v40  ;;  %v3375_v38 = vpack.c.bf16 %v625_v35, %v623_v33  ;;  %v622_v40 = vld [vmem:[%s5861_s2 + $0xa0] sm:$0xff]  ;;  %v629_v47 = vld [vmem:[%s5861_s2 + $0xd8] sm:$0xff]  ;;  %1464 = vst [vmem:[#allocation2] sm:$0xff] %v4007_v50  ;;  %1465 = vst [vmem:[#allocation2 + $0x8] sm:$0xff] %v4007_v50  ;;  %817 = vmatprep.mubr.f32.mxu1 %v4007_v50 }
  0x26   : > { %3166 = vmatmul.mubr.msk.f32.vlgmr.msra.gmra.mrb[0].mxu0 %vm306_vm0, %v330_v36  ;;  %v506_v58 = vsel %vm503_vm2, %v504_v52, %v505_v53  ;;  %v2746_v36 = vld [vmem:[%s5861_s2 + $0x160] sm:$0xff]  ;;  %v3349_v52 = vpack.c.bf16 %v2752_v49, %v2750_v48  ;;  %v628_v54 = vld [vmem:[%s5861_s2 + $0xd0] sm:$0xff]  ;;  %v2755_v55 = vld [vmem:[%s5861_s2 + $0x1a8] sm:$0xff] }
  0x27   : > { %3306 = vmatpush3.bf16.msra.mxu0 %v3303_v20  ;;  %3180 = vmatprep.mubr.msk.f32.mxu0 %vm306_vm0, %v309_v42  ;;  %v2745_v20 = vld [vmem:[%s5861_s2 + $0x158] sm:$0xff]  ;;  %v3345_v39 = vpack.c.bf16 %v2748_v37, %v2746_v36  ;;  %v2754_v62 = vld [vmem:[%s5861_s2 + $0x1a0] sm:$0xff]  ;;  %v2756_v63 = vld [vmem:[%s5861_s2 + $0x1b0] sm:$0xff] }
  0x28   : > { %3308 = vmatprep.subr.bf16.mxu0 %v3307_v41  ;;  %v3339_v21 = vpack.c.bf16 %v2745_v20, %v2743_v19  ;;  %3376 = vmatprep.subr.bf16.mxu1 %v3375_v38  ;;  %v2765_v59 = vld [vmem:[%s5861_s2 + $0x1d8] sm:$0xff]  ;;  %v588_v1 = vld [vmem:[%s5866_s7] ss:$0 sm:$0xff]  ;;  %v2767_v13 = vld [vmem:[%s5861_s2 + $0x1e8] sm:$0xff] }
  0x29   : > { %v2769_v14 = vld [vmem:[%s5861_s2 + $0x1f8] sm:$0xff]  ;;  %v2768_v19 = vld [vmem:[%s5861_s2 + $0x1f0] sm:$0xff]  ;;  %v2771_v20 = vld [vmem:[%s5861_s2 + $0x208] sm:$0xff] }
  0x2a   : > { %v3387_v18 = vpack.c.bf16 %v2769_v14, %v2767_v13  ;;  %v2773_v24 = vld [vmem:[%s5861_s2 + $0x218] sm:$0xff]  ;;  %v2772_v30 = vld [vmem:[%s5861_s2 + $0x210] sm:$0xff]  ;;  %v2775_v32 = vld [vmem:[%s5861_s2 + $0x228] sm:$0xff] }
  0x2b   : > { %3310 = vmatpush3.bf16.msra.mxu0 %v3307_v41  ;;  %v624_v41 = vld [vmem:[%s5861_s2 + $0xb0] sm:$0xff]  ;;  %v3391_v28 = vpack.c.bf16 %v2773_v24, %v2771_v20  ;;  %v2777_v33 = vld [vmem:[%s5861_s2 + $0x238] sm:$0xff]  ;;  %v2774_v36 = vld [vmem:[%s5861_s2 + $0x220] sm:$0xff] }
  0x2c   : > { %3312 = vmatprep.subr.bf16.mxu0 %v3311_v46  ;;  %v3377_v42 = vpack.c.bf16 %v624_v41, %v622_v40  ;;  %v3395_v35 = vpack.c.bf16 %v2777_v33, %v2775_v32  ;;  %v2776_v37 = vld [vmem:[%s5861_s2 + $0x230] sm:$0xff]  ;;  %v2779_v38 = vld [vmem:[%s5861_s2 + $0x248] sm:$0xff]  ;;  %v2782_v48 = vld [vmem:[%s5861_s2 + $0x260] sm:$0xff] }
  0x2d   : > { %v3397_v40 = vpack.c.bf16 %v2776_v37, %v2774_v36  ;;  %v2784_v49 = vld [vmem:[%s5861_s2 + $0x270] sm:$0xff]  ;;  %v2802_v13 = vld [vmem:[%s5862_s3 + $0x1c0] sm:$0xff]  ;;  %v2821_v36 = vld [vmem:[%s5862_s3 + $0x258] sm:$0xff] }
  0x2e   : > { %3378 = vmatpush1.bf16.msra.mxu1 %v3377_v42  ;;  %v2778_v42 = vld [vmem:[%s5861_s2 + $0x240] sm:$0xff]  ;;  %v2816_v33 = vld [vmem:[%s5862_s3 + $0x230] sm:$0xff] }
  0x2f   : > { %3314 = vmatpush3.bf16.msra.mxu0 %v3311_v46  ;;  %v3347_v46 = vpack.c.bf16 %v2753_v44, %v2751_v43  ;;  %v2780_v43 = vld [vmem:[%s5861_s2 + $0x250] sm:$0xff]  ;;  %v2783_v44 = vld [vmem:[%s5861_s2 + $0x268] sm:$0xff]  ;;  %v2806_v20 = vld [vmem:[%s5862_s3 + $0x1e0] sm:$0xff] }
  0x30   : > { %3316 = vmatprep.subr.bf16.mxu0 %v3315_v51  ;;  %v2814_v32 = vld [vmem:[%s5862_s3 + $0x220] sm:$0xff] }
  0x32   : > { %3181 = vmatmul.mubr.msk.f32.vlgmr.msra.gmra.mrb[0].mxu0 %vm306_vm0, %v310_v56 }
  0x33   : > { %3318 = vmatpush3.bf16.msra.mxu0 %v3315_v51  ;;  %3195 = vmatprep.mubr.msk.f32.mxu0 %vm306_vm0, %v506_v58  ;;  %v3379_v51 = vpack.c.bf16 %v629_v47, %v627_v45  ;;  %v2763_v58 = vld [vmem:[%s5861_s2 + $0x1c8] sm:$0xff]  ;;  %v2785_v45 = vld [vmem:[%s5861_s2 + $0x278] sm:$0xff] }
  0x34   : > { %3320 = vmatprep.subr.bf16.mxu0 %v3319_v57  ;;  %v3403_v47 = vpack.c.bf16 %v2785_v45, %v2783_v44  ;;  %v2822_v44 = vld [vmem:[%s5862_s3 + $0x260] sm:$0xff]  ;;  %v2824_v45 = vld [vmem:[%s5862_s3 + $0x270] sm:$0xff] }
  0x35   : > { %3380 = vmatprep.subr.bf16.mxu1 %v3379_v51  ;;  %v2787_v51 = vld [vmem:[%s5861_s2 + $0x288] sm:$0xff] }
  0x37   : > { %3322 = vmatpush3.bf16.msra.mxu0 %v3319_v57  ;;  %v2757_v57 = vld [vmem:[%s5861_s2 + $0x1b8] sm:$0xff] }
  0x38   : > { %3324 = vmatprep.subr.bf16.mxu0 %v3323_v61  ;;  %v3351_v60 = vpack.c.bf16 %v2757_v57, %v2755_v55  ;;  %v2786_v55 = vld [vmem:[%s5861_s2 + $0x280] sm:$0xff] }
  0x3b   : > { %3326 = vmatpush3.bf16.msra.mxu0 %v3323_v61  ;;  %v3383_v61 = vpack.c.bf16 %v2765_v59, %v2763_v58 }
  0x3c   : > { %3328 = vmatprep.subr.bf16.mxu0 %v3327_v0  ;;  %v3353_v0 = vpack.c.bf16 %v2756_v63, %v2754_v62  ;;  %v2795_v63 = vld [vmem:[%s5862_s3 + $0x188] sm:$0xff] }
  0x3e   : > { %3196 = vmatmul.mubr.msk.f32.vlgmr.msra.gmra.mrb[0].mxu0 %vm306_vm0, %v505_v53  ;;  %v626_v53 = vld [vmem:[%s5861_s2 + $0xc0] sm:$0xff] }
  0x3f   : > { %3330 = vmatpush1.bf16.msra.mxu0 %v3329_v5  ;;  %734 = vmatprep.mubr.f32.mxu0 %v4007_v50  ;;  %v3381_v56 = vpack.c.bf16 %v628_v54, %v626_v53  ;;  %v593_v5 = vld [vmem:[%s5866_s7 + $0x1] ss:$0 sm:$0xff]  ;;  %v3405_v53 = vpack.c.bf16 %v2784_v49, %v2782_v48  ;;  %v2829_v48 = vld [vmem:[%s5862_s3 + $0x298] sm:$0xff] }
  0x40   : > { %3332 = vmatprep.subr.bf16.mxu0 %v3331_v6 }
  0x41   : > { %3382 = vmatpush1.bf16.msra.mxu1 %v3381_v56  ;;  %v2788_v56 = vld [vmem:[%s5861_s2 + $0x290] sm:$0xff] }
  0x42   : > { %3384 = vmatprep.subr.bf16.mxu1 %v3383_v61  ;;  %v3409_v59 = vpack.c.bf16 %v2788_v56, %v2786_v55  ;;  %v2833_v55 = vld [vmem:[%s5862_s3 + $0x2b8] sm:$0xff] }
  0x43   : > { %3334 = vmatpush1.bf16.msra.mxu0 %v3333_v11  ;;  %v2762_v11 = vld [vmem:[%s5861_s2 + $0x1c0] sm:$0xff] }
  0x44   : > { %3336 = vmatprep.subr.bf16.mxu0 %v3335_v12  ;;  %v2764_v12 = vld [vmem:[%s5861_s2 + $0x1d0] sm:$0xff] }
  0x45   : > { %v3385_v15 = vpack.c.bf16 %v2764_v12, %v2762_v11  ;;  %v2803_v11 = vld [vmem:[%s5862_s3 + $0x1c8] sm:$0xff]  ;;  %v2805_v12 = vld [vmem:[%s5862_s3 + $0x1d8] sm:$0xff] }
  0x46   : > { %v3419_v14 = vpack.c.bf16 %v2805_v12, %v2803_v11 }
  0x47   : > { %3338 = vmatpush1.bf16.msra.mxu0 %v3337_v16  ;;  %v2766_v16 = vld [vmem:[%s5861_s2 + $0x1e0] sm:$0xff] }
  0x48   : > { %3340 = vmatprep.subr.bf16.mxu0 %v3339_v21  ;;  %v3389_v26 = vpack.c.bf16 %v2768_v19, %v2766_v16  ;;  %v2807_v16 = vld [vmem:[%s5862_s3 + $0x1e8] sm:$0xff] }
  0x4b   : > { %3342 = vmatpush1.bf16.msra.mxu0 %v3341_v29  ;;  %v2770_v29 = vld [vmem:[%s5861_s2 + $0x200] sm:$0xff] }
  0x4c   : > { %3344 = vmatprep.subr.bf16.mxu0 %v3343_v34  ;;  %v3393_v34 = vpack.c.bf16 %v2772_v30, %v2770_v29  ;;  %v2817_v29 = vld [vmem:[%s5862_s3 + $0x238] sm:$0xff] }
  0x4f   : > { %3346 = vmatpush1.bf16.msra.mxu0 %v3345_v39  ;;  %v2781_v39 = vld [vmem:[%s5861_s2 + $0x258] sm:$0xff] }
  0x50   : > { %3348 = vmatprep.subr.bf16.mxu0 %v3347_v46  ;;  %v3399_v41 = vpack.c.bf16 %v2781_v39, %v2779_v38  ;;  %v3401_v46 = vpack.c.bf16 %v2780_v43, %v2778_v42  ;;  %v2818_v38 = vld [vmem:[%s5862_s3 + $0x240] sm:$0xff]  ;;  %v2820_v39 = vld [vmem:[%s5862_s3 + $0x250] sm:$0xff]  ;;  %v2825_v42 = vld [vmem:[%s5862_s3 + $0x278] sm:$0xff] }
  0x53   : > { %3350 = vmatpush1.bf16.msra.mxu0 %v3349_v52  ;;  %v2789_v52 = vld [vmem:[%s5861_s2 + $0x298] sm:$0xff] }
  0x54   : > { %3352 = vmatprep.subr.bf16.mxu0 %v3351_v60  ;;  %v3407_v54 = vpack.c.bf16 %v2789_v52, %v2787_v51  ;;  %v2826_v51 = vld [vmem:[%s5862_s3 + $0x280] sm:$0xff]  ;;  %v2828_v52 = vld [vmem:[%s5862_s3 + $0x290] sm:$0xff] }
  0x57   : > { %3354 = vmatpush1.bf16.msra.mxu0 %v3353_v0  ;;  %v2797_v0 = vld [vmem:[%s5862_s3 + $0x198] sm:$0xff] }
 0x111   : > { %v3197_v2 = vpop.f32.mrb[0].mxu0 }
 0x112   : > { %v590_v3 = vadd.f32 %v3197_v2, %v588_v1  ;;  %v577_v4 = vpop.f32.mrb[1].mxu0  ;;  %v2794_v2 = vld [vmem:[%s5862_s3 + $0x180] sm:$0xff] }
 0x113   : > { %v589_v6 = vadd.f32 %v588_v1, %v577_v4  ;;  %v3411_v1 = vpack.c.bf16 %v2797_v0, %v2795_v63  ;;  %v2836_v0 = vld [vmem:[%s5862_s3 + $0x2d0] sm:$0xff] }
 0x114   : > { %v592_v7 = vmax.f32 %v590_v3, 0.0  ;;  %v2796_v3 = vld [vmem:[%s5862_s3 + $0x190] sm:$0xff] }
 0x115   : > { %v591_v8 = vmax.f32 %v589_v6, 0.0  ;;  %v3413_v4 = vpack.c.bf16 %v2796_v3, %v2794_v2  ;;  %3412 = vmatprep.subr.bf16.mxu0 %v3411_v1  ;;  %v2801_v6 = vld [vmem:[%s5862_s3 + $0x1b8] sm:$0xff]  ;;  %v2839_v1 = vld [vmem:[%s5862_s3 + $0x2e8] sm:$0xff] }
 0x116   : > { %v595_v9 = vadd.f32 %v593_v5, %v592_v7  ;;  %v2841_v2 = vld [vmem:[%s5862_s3 + $0x2f8] sm:$0xff] }
 0x117   : > { %v594_v10 = vadd.f32 %v593_v5, %v591_v8  ;;  %v2799_v5 = vld [vmem:[%s5862_s3 + $0x1a8] sm:$0xff]  ;;  %v2798_v8 = vld [vmem:[%s5862_s3 + $0x1a0] sm:$0xff] }
 0x118   : > { %599 = vst.msk [vmem:[#allocation2 + $0x20] sm:$0x3f] %vm598_vm3, %v595_v9  ;;  %v3415_v7 = vpack.c.bf16 %v2801_v6, %v2799_v5  ;;  %v2800_v9 = vld [vmem:[%s5862_s3 + $0x1b0] sm:$0xff]  ;;  %v2838_v5 = vld [vmem:[%s5862_s3 + $0x2e0] sm:$0xff] }
 0x119   : > { %597 = vst.msk [vmem:[#allocation2 + $0x10] sm:$0xff] %vm596_vm4, %v594_v10  ;;  %v3417_v10 = vpack.c.bf16 %v2800_v9, %v2798_v8  ;;  %v2840_v6 = vld [vmem:[%s5862_s3 + $0x2f0] sm:$0xff]  ;;  %v1000_v8 = vld [vmem:[%s5862_s3 + $0x8] sm:$0xff]  ;;  %v1002_v9 = vld [vmem:[%s5862_s3 + $0x18] sm:$0xff] }
 0x11f   : > { %v631_v17 = vld [vmem:[#allocation2 + $0x20] sm:$0x1f] }
 0x120   : > { %v600_v21 = vld [vmem:[#allocation2 + $0x10] sm:$0xff]  ;;  %v664_v23 = vrot.slane %v631_v17, 1  ;;  %v601_v31 = vld [vmem:[#allocation2 + $0x20] sm:$0xf]  ;;  %v2809_v17 = vld [vmem:[%s5862_s3 + $0x1f8] sm:$0xff] }
 0x121   : > { %v630_v22 = vld [vmem:[#allocation2 + $0x10] sm:$0xfe]  ;;  %2760 = vmatmul.mubr.msk.f32.vlgmr.msra.gmra.mrb[0].mxu1 %vm596_vm4, %v600_v21  ;;  %v831_v58 = vld [vmem:[#allocation2 + $0x20] sm:$0x3f]  ;;  %v3423_v19 = vpack.c.bf16 %v2809_v17, %v2807_v16 }
 0x122   : > { %v663_v25 = vrot.slane %v630_v22, 1  ;;  %3386 = vmatpush1.bf16.msra.mxu1 %v3385_v15  ;;  %823 = vmatprep.mubr.f32.mxu1 %v4007_v50  ;;  %v830_v57 = vld [vmem:[#allocation2 + $0x10] sm:$0xfc]  ;;  %v864_v61 = vrot.slane %v831_v58, 2  ;;  %v2811_v22 = vld [vmem:[%s5862_s3 + $0x208] sm:$0xff] }
 0x123   : > { %3388 = vmatprep.subr.bf16.mxu1 %v3387_v18  ;;  %v863_v60 = vrot.slane %v830_v57, 2  ;;  %v2804_v15 = vld [vmem:[%s5862_s3 + $0x1d0] sm:$0xff]  ;;  %v2830_v57 = vld [vmem:[%s5862_s3 + $0x2a0] sm:$0xff] }
 0x124   : > { %v665_v27 = vsel %vm328_vm1, %v663_v25, %v664_v23  ;;  %v3421_v18 = vpack.c.bf16 %v2804_v15, %v2802_v13  ;;  %v2808_v21 = vld [vmem:[%s5862_s3 + $0x1f0] sm:$0xff]  ;;  %v954_v15 = vlaneseq }
 0x125   : > { %2758 = vmatmul.mubr.msk.f32.vlgmr.msra.gmra.mrb[2].mxu0 %vm596_vm4, %v665_v27  ;;  %2761 = vmatmul.mubr.msk.f32.gmra.mrb[2].mxu1 %vm596_vm4, %v601_v31  ;;  %v865_v62 = vsel %vm503_vm2, %v863_v60, %v864_v61  ;;  %v3425_v24 = vpack.c.bf16 %v2808_v21, %v2806_v20  ;;  %v2812_v27 = vld [vmem:[%s5862_s3 + $0x210] sm:$0xff]  ;;  %v2835_v60 = vld [vmem:[%s5862_s3 + $0x2c8] sm:$0xff] }
 0x126   : > { %740 = vmatprep.mubr.f32.mxu0 %v4007_v50  ;;  %3390 = vmatpush1.bf16.msra.mxu1 %v3389_v26  ;;  %v2810_v26 = vld [vmem:[%s5862_s3 + $0x200] sm:$0xff]  ;;  %v2832_v58 = vld [vmem:[%s5862_s3 + $0x2b0] sm:$0xff]  ;;  %v955_v16 = vshrl.u32 %v954_v15, 7  ;;  %v2899_v21 = vld [vmem:[%s5863_s4 + $0x148] sm:$0xff] }
 0x127   : > { %934 = vmatprep.mubr.f32.mxu1 %v4007_v50  ;;  %3392 = vmatprep.subr.bf16.mxu1 %v3391_v28  ;;  %v2815_v28 = vld [vmem:[%s5862_s3 + $0x228] sm:$0xff]  ;;  %v3429_v30 = vpack.c.bf16 %v2812_v27, %v2810_v26  ;;  %v2900_v26 = vld [vmem:[%s5863_s4 + $0x150] sm:$0xff] }
 0x128   : > { %3414 = vmatpush1.bf16.msra.mxu0 %v3413_v4  ;;  %v3431_v31 = vpack.c.bf16 %v2817_v29, %v2815_v28  ;;  %v3455_v4 = vpack.c.bf16 %v2841_v2, %v2839_v1  ;;  %v4600_v17 = vsub.s32 0, %v955_v16  ;;  %v2793_v20 = vld [vmem:[%s5866_s7 + $0x3] ss:$8 sm:$0x3]  ;;  %v2905_v28 = vld [vmem:[%s5863_s4 + $0x178] sm:$0xff] }
 0x129   : > { %2759 = vmatmul.mubr.msk.f32.gmra.mrb[4].mxu0 %vm596_vm4, %v664_v23  ;;  %3416 = vmatprep.subr.bf16.mxu0 %v3415_v7  ;;  %v2813_v23 = vld [vmem:[%s5862_s3 + $0x218] sm:$0xff]  ;;  %v3457_v7 = vpack.c.bf16 %v2840_v6, %v2838_v5  ;;  %v2903_v27 = vld [vmem:[%s5863_s4 + $0x168] sm:$0xff] }
 0x12a   : > { %3394 = vmatpush1.bf16.msra.mxu1 %v3393_v34  ;;  %v3427_v25 = vpack.c.bf16 %v2813_v23, %v2811_v22  ;;  %v3433_v34 = vpack.c.bf16 %v2816_v33, %v2814_v32  ;;  %v2901_v22 = vld [vmem:[%s5863_s4 + $0x158] sm:$0xff]  ;;  %v2898_v23 = vld [vmem:[%s5863_s4 + $0x140] sm:$0xff]  ;;  %v3559_v32 = vpack.c.bf16 %v2905_v28, %v2903_v27  ;;  %v2915_v1 = vld [vmem:[%s5863_s4 + $0x1c8] sm:$0xff] }
 0x12b   : > { %3396 = vmatprep.subr.bf16.mxu1 %v3395_v35  ;;  %v2819_v35 = vld [vmem:[%s5862_s3 + $0x248] sm:$0xff]  ;;  %v2902_v33 = vld [vmem:[%s5863_s4 + $0x160] sm:$0xff]  ;;  %v2917_v2 = vld [vmem:[%s5863_s4 + $0x1d8] sm:$0xff] }
 0x12c   : > { %3418 = vmatpush1.bf16.msra.mxu0 %v3417_v10  ;;  %v3435_v37 = vpack.c.bf16 %v2821_v36, %v2819_v35  ;;  %v3459_v10 = vpack.c.bf16 %v1002_v9, %v1000_v8  ;;  %v2907_v35 = vld [vmem:[%s5863_s4 + $0x188] sm:$0xff]  ;;  %v2914_v8 = vld [vmem:[%s5863_s4 + $0x1c0] sm:$0xff]  ;;  %v2916_v9 = vld [vmem:[%s5863_s4 + $0x1d0] sm:$0xff] }
 0x12d   : > { %3420 = vmatprep.subr.bf16.mxu0 %v3419_v14 }
 0x12e   : > { %3398 = vmatpush1.bf16.msra.mxu1 %v3397_v40  ;;  %v3437_v40 = vpack.c.bf16 %v2820_v39, %v2818_v38  ;;  %v2909_v38 = vld [vmem:[%s5863_s4 + $0x198] sm:$0xff] }
 0x12f   : > { %3400 = vmatprep.subr.bf16.mxu1 %v3399_v41  ;;  %v2823_v41 = vld [vmem:[%s5862_s3 + $0x268] sm:$0xff] }
 0x130   : > { %3422 = vmatpush1.bf16.msra.mxu0 %v3421_v18  ;;  %v3439_v43 = vpack.c.bf16 %v2825_v42, %v2823_v41  ;;  %v2792_v18 = vld [vmem:[%s5866_s7 + $0x2] ss:$8 sm:$0x3]  ;;  %v978_v42 = vrot.slane %v2793_v20, %v4600_v17 }
 0x131   : > { %3424 = vmatprep.subr.bf16.mxu0 %v3423_v19  ;;  %v4605_v19 = vsub.s32 1, %v955_v16 }
 0x132   : > { %3402 = vmatpush1.bf16.msra.mxu1 %v3401_v46  ;;  %v3441_v46 = vpack.c.bf16 %v2824_v45, %v2822_v44  ;;  %v2906_v44 = vld [vmem:[%s5863_s4 + $0x180] sm:$0xff]  ;;  %v2908_v45 = vld [vmem:[%s5863_s4 + $0x190] sm:$0xff] }
 0x133   : > { %3404 = vmatprep.subr.bf16.mxu1 %v3403_v47  ;;  %v2827_v47 = vld [vmem:[%s5862_s3 + $0x288] sm:$0xff] }
 0x134   : > { %3426 = vmatpush1.bf16.msra.mxu0 %v3425_v24  ;;  %v3443_v49 = vpack.c.bf16 %v2829_v48, %v2827_v47  ;;  %v957_v24 = vrot.slane %v2792_v18, %v4600_v17  ;;  %v982_v47 = vrot.slane %v2793_v20, %v4605_v19 }
 0x135   : > { %3428 = vmatprep.subr.bf16.mxu0 %v3427_v25  ;;  %v3555_v25 = vpack.c.bf16 %v2901_v22, %v2899_v21  ;;  %v999_v22 = vld [vmem:[%s5862_s3] sm:$0xff] }
 0x136   : > { %3406 = vmatpush1.bf16.msra.mxu1 %v3405_v53  ;;  %v3445_v53 = vpack.c.bf16 %v2828_v52, %v2826_v51  ;;  %v2913_v51 = vld [vmem:[%s5863_s4 + $0x1b8] sm:$0xff] }
 0x137   : > { %3408 = vmatprep.subr.bf16.mxu1 %v3407_v54  ;;  %v2831_v54 = vld [vmem:[%s5862_s3 + $0x2a8] sm:$0xff] }
 0x138   : > { %3430 = vmatpush1.bf16.msra.mxu0 %v3429_v30  ;;  %v3447_v56 = vpack.c.bf16 %v2833_v55, %v2831_v54  ;;  %v961_v30 = vrot.slane %v2792_v18, %v4605_v19 }
 0x139   : > { %3432 = vmatprep.subr.bf16.mxu0 %v3431_v31  ;;  %v3557_v31 = vpack.c.bf16 %v2900_v26, %v2898_v23  ;;  %v1001_v23 = vld [vmem:[%s5862_s3 + $0x10] sm:$0xff] }
 0x13a   : > { %3410 = vmatpush1.bf16.msra.mxu1 %v3409_v59  ;;  %v3449_v59 = vpack.c.bf16 %v2832_v58, %v2830_v57  ;;  %v3565_v57 = vpack.c.bf16 %v2908_v45, %v2906_v44  ;;  %v1007_v45 = vld [vmem:[%s5862_s3 + $0x40] sm:$0xff] }
 0x13b   : > { %3556 = vmatprep.subr.bf16.mxu1 %v3555_v25 }
 0x13c   : > { %3434 = vmatpush1.bf16.msra.mxu0 %v3433_v34  ;;  %v2904_v34 = vld [vmem:[%s5863_s4 + $0x170] sm:$0xff] }
 0x13d   : > { %2790 = vmatmul.mubr.msk.f32.vlgmr.msra.gmra.mrb[0].mxu1 %vm596_vm4, %v865_v62  ;;  %3436 = vmatprep.subr.bf16.mxu0 %v3435_v37  ;;  %v2834_v62 = vld [vmem:[%s5862_s3 + $0x2c0] sm:$0xff] }
 0x13e   : > { %940 = vmatprep.mubr.f32.mxu1 %v4007_v50  ;;  %v3453_v3 = vpack.c.bf16 %v2836_v0, %v2834_v62  ;;  %3558 = vmatpush1.bf16.msra.mxu1 %v3557_v31  ;;  %v2912_v62 = vld [vmem:[%s5863_s4 + $0x1b0] sm:$0xff] }
 0x13f   : > { %3560 = vmatprep.subr.bf16.mxu1 %v3559_v32 }
 0x140   : > { %3438 = vmatpush1.bf16.msra.mxu0 %v3437_v40  ;;  %v3561_v40 = vpack.c.bf16 %v2904_v34, %v2902_v33 }
 0x141   : > { %2791 = vmatmul.mubr.msk.f32.gmra.mrb[2].mxu1 %vm596_vm4, %v864_v61  ;;  %3440 = vmatprep.subr.bf16.mxu0 %v3439_v43  ;;  %v2837_v61 = vld [vmem:[%s5862_s3 + $0x2d8] sm:$0xff]  ;;  %v3563_v43 = vpack.c.bf16 %v2909_v38, %v2907_v35 }
 0x142   : > { %v3451_v63 = vpack.c.bf16 %v2837_v61, %v2835_v60  ;;  %3562 = vmatpush1.bf16.msra.mxu1 %v3561_v40  ;;  %v2910_v61 = vld [vmem:[%s5863_s4 + $0x1a0] sm:$0xff]  ;;  %v1005_v40 = vld [vmem:[%s5862_s3 + $0x30] sm:$0xff] }
 0x143   : > { %3564 = vmatprep.subr.bf16.mxu1 %v3563_v43  ;;  %v3569_v5 = vpack.c.bf16 %v2912_v62, %v2910_v61  ;;  %v1020_v61 = vld [vmem:[%s5862_s3 + $0xa8] sm:$0xff]  ;;  %v1022_v62 = vld [vmem:[%s5862_s3 + $0xb8] sm:$0xff] }
 0x144   : > { %3442 = vmatpush1.bf16.msra.mxu0 %v3441_v46 }
 0x145   : > { %3444 = vmatprep.subr.bf16.mxu0 %v3443_v49  ;;  %v2911_v49 = vld [vmem:[%s5863_s4 + $0x1a8] sm:$0xff] }
 0x146   : > { %v3567_v60 = vpack.c.bf16 %v2913_v51, %v2911_v49  ;;  %3566 = vmatpush1.bf16.msra.mxu1 %v3565_v57 }
 0x148   : > { %3446 = vmatpush1.bf16.msra.mxu0 %v3445_v53  ;;  %3568 = vmatprep.subr.bf16.mxu1 %v3567_v60  ;;  %v1017_v60 = vld [vmem:[%s5862_s3 + $0x90] sm:$0xff] }
 0x149   : > { %3448 = vmatprep.subr.bf16.mxu0 %v3447_v56 }
 0x14a   : > { %3570 = vmatpush1.bf16.msra.mxu1 %v3569_v5 }
 0x14c   : > { %3450 = vmatpush1.bf16.msra.mxu0 %v3449_v59 }
 0x14d   : > { %3452 = vmatprep.subr.bf16.mxu0 %v3451_v63 }
 0x150   : > { %3454 = vmatpush1.bf16.msra.mxu0 %v3453_v3 }
 0x151   : > { %3456 = vmatprep.subr.bf16.mxu0 %v3455_v4 }
 0x154   : > { %3458 = vmatpush1.bf16.msra.mxu0 %v3457_v7  ;;  %v3571_v7 = vpack.c.bf16 %v2917_v2, %v2915_v1  ;;  %v1019_v1 = vld [vmem:[%s5862_s3 + $0xa0] sm:$0xff]  ;;  %v1021_v2 = vld [vmem:[%s5862_s3 + $0xb0] sm:$0xff] }
 0x155   : > { %3460 = vmatprep.subr.bf16.mxu0 %v3459_v10  ;;  %v3481_v5 = vpack.c.bf16 %v1021_v2, %v1019_v1  ;;  %v2854_v2 = vld [vmem:[%s5862_s3 + $0x340] sm:$0xff] }
 0x156   : > { %3572 = vmatprep.subr.bf16.mxu1 %v3571_v7  ;;  %v1023_v7 = vld [vmem:[%s5862_s3 + $0xc0] sm:$0xff] }
 0x1f8   : > { %v736_v11 = vpop.f32.mrb[2].mxu0 }
 0x1f9   : > { %v738_v12 = vpop.f32.mrb[3].mxu0 }
 0x1fc   : > { %v742_v13 = vpop.f32.mrb[4].mxu0 }
 0x1fd   : > { %v744_v14 = vpop.f32.mrb[5].mxu0 }
 0x210   : > { %v936_v29 = vpop.f32.mrb[0].mxu1 }
 0x211   : > { %v3867_v36 = vadd.f32 %v936_v29, %v736_v11  ;;  %v938_v37 = vpop.f32.mrb[1].mxu1  ;;  %v2919_v11 = vld [vmem:[%s5863_s4 + $0x1e8] sm:$0xff] }
 0x212   : > { %v3868_v39 = vadd.f32 %v938_v37, %v738_v12  ;;  %v2921_v12 = vld [vmem:[%s5863_s4 + $0x1f8] sm:$0xff]  ;;  %v1004_v29 = vld [vmem:[%s5862_s3 + $0x28] sm:$0xff] }
 0x213   : > { %v964_v41 = vadd.f32 %v3867_v36, %v957_v24  ;;  %v3461_v36 = vpack.c.bf16 %v1001_v23, %v999_v22  ;;  %v1031_v23 = vld [vmem:[%s5862_s3 + $0x100] sm:$0xff] }
 0x214   : > { %v965_v46 = vadd.f32 %v3868_v39, %v961_v30  ;;  %v942_v48 = vpop.f32.mrb[2].mxu1  ;;  %v1003_v39 = vld [vmem:[%s5862_s3 + $0x20] sm:$0xff] }
 0x215   : > { %v968_v52 = vmax.f32 %v964_v41, 0.0  ;;  %v3869_v53 = vadd.f32 %v942_v48, %v742_v13  ;;  %v944_v54 = vpop.f32.mrb[3].mxu1  ;;  %v3573_v13 = vpack.c.bf16 %v2916_v9, %v2914_v8  ;;  %v3465_v43 = vpack.c.bf16 %v1005_v40, %v1003_v39  ;;  %v1014_v48 = vld [vmem:[%s5862_s3 + $0x78] sm:$0xff]  ;;  %v1025_v8 = vld [vmem:[%s5862_s3 + $0xd0] sm:$0xff]  ;;  %v1028_v9 = vld [vmem:[%s5862_s3 + $0xe8] sm:$0xff] }
 0x216   : > { %v969_v55 = vmax.f32 %v965_v46, 0.0  ;;  %v3870_v56 = vadd.f32 %v944_v54, %v744_v14  ;;  %v3575_v14 = vpack.c.bf16 %v2921_v12, %v2919_v11  ;;  %v1009_v46 = vld [vmem:[%s5862_s3 + $0x50] sm:$0xff]  ;;  %v1016_v54 = vld [vmem:[%s5862_s3 + $0x88] sm:$0xff]  ;;  %v3485_v11 = vpack.c.bf16 %v1025_v8, %v1023_v7  ;;  %v1039_v39 = vld [vmem:[%s5862_s3 + $0x140] sm:$0xff] }
 0x217   : > { %v4656_v58 = vadd.f32 %v978_v42, %v968_v52  ;;  %v966_v59 = vadd.f32 %v3869_v53, %v957_v24  ;;  %3574 = vmatpush1.bf16.msra.mxu1 %v3573_v13  ;;  %v3469_v49 = vpack.c.bf16 %v1009_v46, %v1007_v45  ;;  %v1011_v52 = vld [vmem:[%s5862_s3 + $0x60] sm:$0xff]  ;;  %v1013_v53 = vld [vmem:[%s5862_s3 + $0x70] sm:$0xff]  ;;  %v2847_v46 = vld [vmem:[%s5862_s3 + $0x308] sm:$0xff] }
 0x218   : > { %v986_v63 = vadd.f32 %v982_v47, %v969_v55  ;;  %v967_v0 = vadd.f32 %v3870_v56, %v961_v30  ;;  %3576 = vmatprep.subr.bf16.mxu1 %v3575_v14  ;;  %v1006_v30 = vld [vmem:[%s5862_s3 + $0x38] sm:$0xff]  ;;  %v3473_v56 = vpack.c.bf16 %v1013_v53, %v1011_v52  ;;  %v1027_v13 = vld [vmem:[%s5862_s3 + $0xe0] sm:$0xff]  ;;  %v1029_v14 = vld [vmem:[%s5862_s3 + $0xf0] sm:$0xff] }
 0x219   : > { %989 = vst [vmem:[#allocation2 + $0x10] sm:$0xff] %v4656_v58  ;;  %v970_v3 = vmax.f32 %v966_v59, 0.0  ;;  %v3463_v38 = vpack.c.bf16 %v1006_v30, %v1004_v29  ;;  %v1018_v55 = vld [vmem:[%s5862_s3 + $0x98] sm:$0xff]  ;;  %v1015_v59 = vld [vmem:[%s5862_s3 + $0x80] sm:$0xff]  ;;  %v1041_v40 = vld [vmem:[%s5862_s3 + $0x150] sm:$0xff] }
 0x21a   : > { %991 = vst.msk [vmem:[#allocation2 + $0x18] sm:$0xff] %vm990_vm5, %v986_v63  ;;  %v971_v4 = vmax.f32 %v967_v0, 0.0  ;;  %v3475_v57 = vpack.c.bf16 %v1018_v55, %v1016_v54  ;;  %v3477_v63 = vpack.c.bf16 %v1017_v60, %v1015_v59  ;;  %v3479_v0 = vpack.c.bf16 %v1022_v62, %v1020_v61  ;;  %v1045_v45 = vld [vmem:[%s5862_s3 + $0x170] sm:$0xff]  ;;  %v2851_v53 = vld [vmem:[%s5862_s3 + $0x328] sm:$0xff]  ;;  %v2853_v54 = vld [vmem:[%s5862_s3 + $0x338] sm:$0xff] }
 0x21b   : > { %v987_v6 = vadd.f32 %v978_v42, %v970_v3  ;;  %v1008_v42 = vld [vmem:[%s5862_s3 + $0x48] sm:$0xff]  ;;  %v2848_v52 = vld [vmem:[%s5862_s3 + $0x310] sm:$0xff]  ;;  %v2857_v61 = vld [vmem:[%s5862_s3 + $0x358] sm:$0xff] }
 0x21c   : > { %v988_v10 = vadd.f32 %v982_v47, %v971_v4  ;;  %v1012_v47 = vld [vmem:[%s5862_s3 + $0x68] sm:$0xff]  ;;  %v1026_v4 = vld [vmem:[%s5862_s3 + $0xd8] sm:$0xff]  ;;  %v2852_v59 = vld [vmem:[%s5862_s3 + $0x330] sm:$0xff] }
 0x21d   : > { %992 = vst [vmem:[#allocation2 + $0x20] sm:$0xf] %v987_v6  ;;  %v3471_v51 = vpack.c.bf16 %v1014_v48, %v1012_v47  ;;  %v1024_v3 = vld [vmem:[%s5862_s3 + $0xc8] sm:$0xff]  ;;  %v2849_v47 = vld [vmem:[%s5862_s3 + $0x318] sm:$0xff]  ;;  %v2860_v7 = vld [vmem:[%s5862_s3 + $0x370] sm:$0xff] }
 0x21e   : > { %994 = vst.msk [vmem:[#allocation2 + $0x28] sm:$0xf] %vm993_vm6, %v988_v10  ;;  %v3483_v6 = vpack.c.bf16 %v1026_v4, %v1024_v3  ;;  %v1030_v10 = vld [vmem:[%s5862_s3 + $0xf8] sm:$0xff]  ;;  %v2855_v60 = vld [vmem:[%s5862_s3 + $0x348] sm:$0xff]  ;;  %v2856_v3 = vld [vmem:[%s5862_s3 + $0x350] sm:$0xff] }
 0x21f   : > { %v3487_v12 = vpack.c.bf16 %v1030_v10, %v1028_v9  ;;  %v3515_v1 = vpack.c.bf16 %v2857_v61, %v2855_v60  ;;  %v3517_v4 = vpack.c.bf16 %v2856_v3, %v2854_v2  ;;  %v2865_v8 = vld [vmem:[%s5862_s3 + $0x398] sm:$0xff] }
 0x220   : > { %v1047_v15 = vld [vmem:[#allocation2 + $0x10] sm:$0xfe] }
 0x221   : > { %v4685_v16 = vld [vmem:[#allocation2 + $0x10] sm:$0xfc]  ;;  %v1048_v18 = vld [vmem:[#allocation2 + $0x18] sm:$0xfe]  ;;  %v1104_v35 = vrot.slane %v1047_v15, 1  ;;  %v1032_v15 = vld [vmem:[%s5862_s3 + $0x108] sm:$0xff] }
 0x222   : > { %v996_v20 = vld [vmem:[#allocation2 + $0x18] sm:$0xff]  ;;  %2312 = vst [vmem:[#allocation2 + $0x10] sm:$0xff] %v4007_v50  ;;  %v1107_v31 = vrot.slane %v1048_v18, 1  ;;  %v1333_v3 = vrot.slane %v4685_v16, 2  ;;  %v2923_v16 = vld [vmem:[%s5863_s4 + $0x208] sm:$0xff] }
 0x223   : > { %v4687_v21 = vld [vmem:[#allocation2 + $0x18] sm:$0xfc] }
 0x224   : > { %1467 = vst [vmem:[#allocation2 + $0x18] sm:$0xff] %v4007_v50  ;;  %v1049_v24 = vld [vmem:[#allocation2 + $0x20] sm:$0x7]  ;;  %v1034_v18 = vld [vmem:[%s5862_s3 + $0x118] sm:$0xff] }
 0x225   : > { %v4697_v25 = vld [vmem:[#allocation2 + $0x20] sm:$0x3]  ;;  %v1050_v27 = vld [vmem:[#allocation2 + $0x28] sm:$0x7]  ;;  %v1105_v28 = vrot.slane %v1049_v24, 1  ;;  %v3491_v22 = vpack.c.bf16 %v1034_v18, %v1032_v15  ;;  %v1033_v24 = vld [vmem:[%s5862_s3 + $0x110] sm:$0xff] }
 0x226   : > { %v4699_v26 = vld [vmem:[#allocation2 + $0x20] sm:$0xf]  ;;  %v1108_v32 = vrot.slane %v1050_v27, 1  ;;  %v4708_v33 = vld [vmem:[#allocation2 + $0x28] sm:$0x3]  ;;  %v3493_v29 = vpack.c.bf16 %v1033_v24, %v1031_v23  ;;  %v2873_v24 = vld [vmem:[%s5862_s3 + $0x3d8] sm:$0xff] }
 0x227   : > { %1468 = vst [vmem:[#allocation2 + $0x20] sm:$0xff] %v4007_v50  ;;  %v4710_v34 = vld [vmem:[#allocation2 + $0x28] sm:$0xf]  ;;  %v1106_v41 = vsel %vm328_vm1, %v1104_v35, %v1105_v28  ;;  %v1334_v2 = vrot.slane %v4699_v26, 2 }
 0x228   : > { %1469 = vst [vmem:[#allocation2 + $0x28] sm:$0xff] %v4007_v50  ;;  %v1109_v37 = vsel %vm328_vm1, %v1107_v31, %v1108_v32  ;;  %v1010_v50 = vld [vmem:[%s5862_s3 + $0x58] sm:$0xff]  ;;  %v1036_v27 = vld [vmem:[%s5862_s3 + $0x128] sm:$0xff]  ;;  %v1035_v31 = vld [vmem:[%s5862_s3 + $0x120] sm:$0xff]  ;;  %v1337_v62 = vrot.slane %v4710_v34, 2 }
 0x229   : > { %2842 = vmatprep.mubr.msk.f32.mxu0 %vm990_vm5, %v1109_v37  ;;  %v3467_v44 = vpack.c.bf16 %v1010_v50, %v1008_v42  ;;  %v1040_v35 = vld [vmem:[%s5862_s3 + $0x148] sm:$0xff]  ;;  %v1046_v42 = vld [vmem:[%s5862_s3 + $0x178] sm:$0xff]  ;;  %v3501_v50 = vpack.c.bf16 %v1041_v40, %v1039_v39 }
 0x22a   : > { %1181 = vmatmul.mubr.f32.vlgmr.msra.gmra.mrb[6].mxu0 %v1106_v41  ;;  %v1044_v41 = vld [vmem:[%s5862_s3 + $0x168] sm:$0xff]  ;;  %v2881_v40 = vld [vmem:[%s5862_s3 + $0x418] sm:$0xff] }
 0x22b   : > { %3462 = vmatpush1.bf16.msra.mxu0 %v3461_v36  ;;  %2843 = vmatprep.mubr.msk.f32.mxu0 %vm990_vm5, %v1108_v32  ;;  %v1037_v32 = vld [vmem:[%s5862_s3 + $0x130] sm:$0xff]  ;;  %v1042_v36 = vld [vmem:[%s5862_s3 + $0x158] sm:$0xff]  ;;  %v2871_v23 = vld [vmem:[%s5862_s3 + $0x3c8] sm:$0xff] }
 0x22c   : > { %3464 = vmatprep.subr.bf16.mxu0 %v3463_v38  ;;  %v3497_v37 = vpack.c.bf16 %v1037_v32, %v1035_v31  ;;  %v3499_v38 = vpack.c.bf16 %v1042_v36, %v1040_v35  ;;  %v2875_v31 = vld [vmem:[%s5862_s3 + $0x3e8] sm:$0xff]  ;;  %v2877_v32 = vld [vmem:[%s5862_s3 + $0x3f8] sm:$0xff] }
 0x22d   : > { %v3535_v36 = vpack.c.bf16 %v2877_v32, %v2875_v31  ;;  %v2879_v39 = vld [vmem:[%s5862_s3 + $0x408] sm:$0xff]  ;;  %v2925_v34 = vld [vmem:[%s5863_s4 + $0x218] sm:$0xff]  ;;  %v2936_v31 = vld [vmem:[%s5863_s4 + $0x270] sm:$0xff] }
 0x22e   : > { %1187 = vmatmul.mubr.f32.gmra.mrb[8].mxu0 %v1105_v28  ;;  %v1038_v28 = vld [vmem:[%s5862_s3 + $0x138] sm:$0xff] }
 0x22f   : > { %3466 = vmatpush1.bf16.msra.mxu0 %v3465_v43  ;;  %2844 = vmatprep.mubr.msk.f32.mxu0 %vm990_vm5, %v996_v20  ;;  %v3489_v20 = vpack.c.bf16 %v1029_v14, %v1027_v13  ;;  %v3495_v30 = vpack.c.bf16 %v1038_v28, %v1036_v27  ;;  %v3503_v43 = vpack.c.bf16 %v1046_v42, %v1044_v41  ;;  %v2867_v13 = vld [vmem:[%s5862_s3 + $0x3a8] sm:$0xff]  ;;  %v2869_v14 = vld [vmem:[%s5862_s3 + $0x3b8] sm:$0xff] }
 0x230   : > { %3468 = vmatprep.subr.bf16.mxu0 %v3467_v44  ;;  %v1043_v44 = vld [vmem:[%s5862_s3 + $0x160] sm:$0xff]  ;;  %v3527_v18 = vpack.c.bf16 %v2869_v14, %v2867_v13  ;;  %v3531_v28 = vpack.c.bf16 %v2873_v24, %v2871_v23  ;;  %v3539_v42 = vpack.c.bf16 %v2881_v40, %v2879_v39  ;;  %v2931_v14 = vld [vmem:[%s5863_s4 + $0x248] sm:$0xff]  ;;  %v2932_v23 = vld [vmem:[%s5863_s4 + $0x250] sm:$0xff] }
 0x231   : > { %v3505_v48 = vpack.c.bf16 %v1045_v45, %v1043_v44  ;;  %v2883_v44 = vld [vmem:[%s5862_s3 + $0x428] sm:$0xff]  ;;  %v2885_v45 = vld [vmem:[%s5862_s3 + $0x438] sm:$0xff]  ;;  %v5036_v13 = vld [vmem:[#allocation2] sm:$0xc0] }
 0x232   : > { %v2986_v40 = vld [vmem:[%s5864_s5 + $0xc0] sm:$0xff] }
 0x233   : > { %3470 = vmatpush1.bf16.msra.mxu0 %v3469_v49  ;;  %v3507_v49 = vpack.c.bf16 %v2849_v47, %v2847_v46  ;;  %v3543_v47 = vpack.c.bf16 %v2885_v45, %v2883_v44  ;;  %v2989_v44 = vld [vmem:[%s5864_s5 + $0xd8] sm:$0xff] }
 0x234   : > { %3472 = vmatprep.subr.bf16.mxu0 %v3471_v51  ;;  %v2846_v51 = vld [vmem:[%s5862_s3 + $0x300] sm:$0xff] }
 0x235   : > { %v3509_v55 = vpack.c.bf16 %v2848_v52, %v2846_v51  ;;  %v2887_v51 = vld [vmem:[%s5862_s3 + $0x448] sm:$0xff]  ;;  %v2889_v52 = vld [vmem:[%s5862_s3 + $0x458] sm:$0xff] }
 0x237   : > { %3474 = vmatpush1.bf16.msra.mxu0 %v3473_v56  ;;  %v3511_v56 = vpack.c.bf16 %v2853_v54, %v2851_v53  ;;  %v3547_v54 = vpack.c.bf16 %v2889_v52, %v2887_v51  ;;  %v2993_v51 = vld [vmem:[%s5864_s5 + $0xf8] sm:$0xff] }
 0x238   : > { %3476 = vmatprep.subr.bf16.mxu0 %v3475_v57  ;;  %v2850_v57 = vld [vmem:[%s5862_s3 + $0x320] sm:$0xff] }
 0x23b   : > { %3478 = vmatpush1.bf16.msra.mxu0 %v3477_v63  ;;  %v3513_v63 = vpack.c.bf16 %v2852_v59, %v2850_v57  ;;  %v2891_v57 = vld [vmem:[%s5862_s3 + $0x468] sm:$0xff]  ;;  %v2893_v59 = vld [vmem:[%s5862_s3 + $0x478] sm:$0xff] }
 0x23c   : > { %3480 = vmatprep.subr.bf16.mxu0 %v3479_v0  ;;  %v1336_v0 = vrot.slane %v4687_v21, 2  ;;  %v3551_v61 = vpack.c.bf16 %v2893_v59, %v2891_v57  ;;  %v2997_v57 = vld [vmem:[%s5864_s5 + $0x118] sm:$0xff]  ;;  %v2896_v59 = vld [vmem:[%s5866_s7 + $0x4] ss:$8 sm:$0x3] }
 0x23e   : > { %v1338_v21 = vsel %vm503_vm2, %v1336_v0, %v1337_v62  ;;  %v2892_v0 = vld [vmem:[%s5862_s3 + $0x470] sm:$0xff] }
 0x23f   : > { %3482 = vmatpush1.bf16.msra.mxu0 %v3481_v5 }
 0x240   : > { %3484 = vmatprep.subr.bf16.mxu0 %v3483_v6  ;;  %v2858_v6 = vld [vmem:[%s5862_s3 + $0x360] sm:$0xff] }
 0x241   : > { %v3521_v9 = vpack.c.bf16 %v2860_v7, %v2858_v6  ;;  %v2927_v7 = vld [vmem:[%s5863_s4 + $0x228] sm:$0xff] }
 0x243   : > { %3486 = vmatpush1.bf16.msra.mxu0 %v3485_v11  ;;  %v2862_v11 = vld [vmem:[%s5862_s3 + $0x380] sm:$0xff] }
 0x244   : > { %3488 = vmatprep.subr.bf16.mxu0 %v3487_v12  ;;  %v2864_v12 = vld [vmem:[%s5862_s3 + $0x390] sm:$0xff] }
 0x245   : > { %v3525_v15 = vpack.c.bf16 %v2864_v12, %v2862_v11  ;;  %v5034_v12 = vld [vmem:[#allocation2] sm:$0x80] }
 0x247   : > { %3490 = vmatpush1.bf16.msra.mxu0 %v3489_v20  ;;  %v2866_v20 = vld [vmem:[%s5862_s3 + $0x3a0] sm:$0xff] }
 0x248   : > { %3492 = vmatprep.subr.bf16.mxu0 %v3491_v22  ;;  %v2868_v22 = vld [vmem:[%s5862_s3 + $0x3b0] sm:$0xff] }
 0x249   : > { %v3529_v27 = vpack.c.bf16 %v2868_v22, %v2866_v20  ;;  %v2930_v22 = vld [vmem:[%s5863_s4 + $0x240] sm:$0xff] }
 0x24a   : > { %v3589_v24 = vpack.c.bf16 %v2932_v23, %v2930_v22  ;;  %v1482_v22 = vld [vmem:[%s5863_s4] sm:$0xff]  ;;  %v1484_v23 = vld [vmem:[%s5863_s4 + $0x10] sm:$0xff] }
 0x24b   : > { %3494 = vmatpush1.bf16.msra.mxu0 %v3493_v29  ;;  %v2870_v29 = vld [vmem:[%s5862_s3 + $0x3c0] sm:$0xff] }
 0x24c   : > { %3496 = vmatprep.subr.bf16.mxu0 %v3495_v30  ;;  %v2872_v30 = vld [vmem:[%s5862_s3 + $0x3d0] sm:$0xff] }
 0x24d   : > { %v3533_v35 = vpack.c.bf16 %v2872_v30, %v2870_v29  ;;  %v2934_v29 = vld [vmem:[%s5863_s4 + $0x260] sm:$0xff] }
 0x24e   : > { %v3593_v32 = vpack.c.bf16 %v2936_v31, %v2934_v29  ;;  %v1487_v29 = vld [vmem:[%s5863_s4 + $0x28] sm:$0xff] }
 0x24f   : > { %3498 = vmatpush1.bf16.msra.mxu0 %v3497_v37  ;;  %v2874_v37 = vld [vmem:[%s5862_s3 + $0x3e0] sm:$0xff] }
 0x250   : > { %3500 = vmatprep.subr.bf16.mxu0 %v3499_v38  ;;  %v2876_v38 = vld [vmem:[%s5862_s3 + $0x3f0] sm:$0xff] }
 0x251   : > { %v3537_v41 = vpack.c.bf16 %v2876_v38, %v2874_v37  ;;  %v1485_v37 = vld [vmem:[%s5863_s4 + $0x18] sm:$0xff]  ;;  %v5073_v38 = vld [vmem:[#allocation2 + $0x8] sm:$0xc0] }
 0x253   : > { %3502 = vmatpush1.bf16.msra.mxu0 %v3501_v50  ;;  %v2878_v50 = vld [vmem:[%s5862_s3 + $0x400] sm:$0xff] }
 0x254   : > { %3504 = vmatprep.subr.bf16.mxu0 %v3503_v43  ;;  %v2880_v43 = vld [vmem:[%s5862_s3 + $0x410] sm:$0xff] }
 0x255   : > { %v3541_v46 = vpack.c.bf16 %v2880_v43, %v2878_v50  ;;  %v2988_v43 = vld [vmem:[%s5864_s5 + $0xd0] sm:$0xff] }
 0x256   : > { %v3679_v45 = vpack.c.bf16 %v2989_v44, %v2988_v43 }
 0x257   : > { %3506 = vmatpush1.bf16.msra.mxu0 %v3505_v48  ;;  %v2882_v48 = vld [vmem:[%s5862_s3 + $0x420] sm:$0xff] }
 0x258   : > { %3508 = vmatprep.subr.bf16.mxu0 %v3507_v49  ;;  %v2884_v49 = vld [vmem:[%s5862_s3 + $0x430] sm:$0xff] }
 0x259   : > { %v3545_v53 = vpack.c.bf16 %v2884_v49, %v2882_v48  ;;  %v2992_v49 = vld [vmem:[%s5864_s5 + $0xf0] sm:$0xff] }
 0x25a   : > { %1264 = vmatmul.mubr.f32.vlgmr.msra.gmra.mrb[6].mxu0 %v4656_v58  ;;  %v2859_v58 = vld [vmem:[%s5862_s3 + $0x368] sm:$0xff]  ;;  %v3685_v52 = vpack.c.bf16 %v2993_v51, %v2992_v49 }
 0x25b   : > { %2845 = vmatprep.mubr.msk.f32.mxu0 %vm990_vm5, %v4708_v33  ;;  %3510 = vmatpush1.bf16.msra.mxu0 %v3509_v55  ;;  %v2861_v33 = vld [vmem:[%s5862_s3 + $0x378] sm:$0xff]  ;;  %v2886_v55 = vld [vmem:[%s5862_s3 + $0x440] sm:$0xff] }
 0x25c   : > { %3512 = vmatprep.subr.bf16.mxu0 %v3511_v56  ;;  %v3519_v5 = vpack.c.bf16 %v2861_v33, %v2859_v58  ;;  %v2888_v56 = vld [vmem:[%s5862_s3 + $0x450] sm:$0xff]  ;;  %v1335_v58 = vsel %vm503_vm2, %v1333_v3, %v1334_v2  ;;  %v2918_v33 = vld [vmem:[%s5863_s4 + $0x1e0] sm:$0xff] }
 0x25d   : > { %v3549_v60 = vpack.c.bf16 %v2888_v56, %v2886_v55  ;;  %v2996_v56 = vld [vmem:[%s5864_s5 + $0x110] sm:$0xff] }
 0x25e   : > { %1270 = vmatmul.mubr.f32.gmra.mrb[8].mxu0 %v4697_v25  ;;  %v2863_v25 = vld [vmem:[%s5862_s3 + $0x388] sm:$0xff] }
 0x25f   : > { %3514 = vmatpush1.bf16.msra.mxu0 %v3513_v63  ;;  %2894 = vmatprep.mubr.msk.f32.mxu0 %vm990_vm5, %v1338_v21  ;;  %v3523_v10 = vpack.c.bf16 %v2865_v8, %v2863_v25  ;;  %v2890_v63 = vld [vmem:[%s5862_s3 + $0x460] sm:$0xff]  ;;  %v2920_v21 = vld [vmem:[%s5863_s4 + $0x1f0] sm:$0xff]  ;;  %v2929_v25 = vld [vmem:[%s5863_s4 + $0x238] sm:$0xff] }
 0x260   : > { %3516 = vmatprep.subr.bf16.mxu0 %v3515_v1  ;;  %v3553_v1 = vpack.c.bf16 %v2892_v0, %v2890_v63  ;;  %v3577_v26 = vpack.c.bf16 %v2920_v21, %v2918_v33  ;;  %v3583_v8 = vpack.c.bf16 %v2929_v25, %v2927_v7  ;;  %v2999_v63 = vld [vmem:[%s5864_s5 + $0x128] sm:$0xff]  ;;  %v1436_v0 = vrot.slane %v2896_v59, %v4605_v19 }
 0x262   : > { %3578 = vmatpush1.bf16.msra.mxu1 %v3577_v26 }
 0x263   : > { %3518 = vmatpush1.bf16.msra.mxu0 %v3517_v4  ;;  %v2922_v4 = vld [vmem:[%s5863_s4 + $0x200] sm:$0xff] }
 0x264   : > { %3520 = vmatprep.subr.bf16.mxu0 %v3519_v5  ;;  %v2924_v5 = vld [vmem:[%s5863_s4 + $0x210] sm:$0xff] }
 0x265   : > { %v3581_v6 = vpack.c.bf16 %v2924_v5, %v2922_v4 }
 0x267   : > { %3522 = vmatpush1.bf16.msra.mxu0 %v3521_v9  ;;  %v2926_v9 = vld [vmem:[%s5863_s4 + $0x220] sm:$0xff] }
 0x268   : > { %3524 = vmatprep.subr.bf16.mxu0 %v3523_v10  ;;  %v2928_v10 = vld [vmem:[%s5863_s4 + $0x230] sm:$0xff] }
 0x269   : > { %v3585_v11 = vpack.c.bf16 %v2928_v10, %v2926_v9 }
 0x26b   : > { %3526 = vmatpush1.bf16.msra.mxu0 %v3525_v15  ;;  %v2933_v15 = vld [vmem:[%s5863_s4 + $0x258] sm:$0xff] }
 0x26c   : > { %3528 = vmatprep.subr.bf16.mxu0 %v3527_v18  ;;  %v5044_v18 = vld [vmem:[#allocation2 + $0x8] sm:$0xff]  ;;  %v3587_v20 = vpack.c.bf16 %v2933_v15, %v2931_v14 }
 0x26d   : > { %1932 = vst [vmem:[#allocation2] sm:$0xff] %v5044_v18 }
 0x26f   : > { %3530 = vmatpush1.bf16.msra.mxu0 %v3529_v27  ;;  %v2935_v27 = vld [vmem:[%s5863_s4 + $0x268] sm:$0xff] }
 0x270   : > { %3532 = vmatprep.subr.bf16.mxu0 %v3531_v28  ;;  %v2937_v28 = vld [vmem:[%s5863_s4 + $0x278] sm:$0xff] }
 0x271   : > { %v3591_v30 = vpack.c.bf16 %v2937_v28, %v2935_v27  ;;  %v1574_v27 = vrot.slane %v5034_v12, 7  ;;  %v1486_v12 = vld [vmem:[%s5863_s4 + $0x20] sm:$0xff] }
 0x273   : > { %3534 = vmatpush1.bf16.msra.mxu0 %v3533_v35  ;;  %v5065_v35 = vld [vmem:[#allocation2 + $0x8] sm:$0x80] }
 0x274   : > { %3536 = vmatprep.subr.bf16.mxu0 %v3535_v36  ;;  %v1483_v36 = vld [vmem:[%s5863_s4 + $0x8] sm:$0xff]  ;;  %1933 = vst [vmem:[#allocation2 + $0x8] sm:$0xff] %v5044_v18 }
 0x275   : > { %v3595_v39 = vpack.c.bf16 %v1485_v37, %v1483_v36 }
 0x277   : > { %3538 = vmatpush1.bf16.msra.mxu0 %v3537_v41  ;;  %v2987_v41 = vld [vmem:[%s5864_s5 + $0xc8] sm:$0xff] }
 0x278   : > { %3540 = vmatprep.subr.bf16.mxu0 %v3539_v42  ;;  %v4008_v42 = vmov 0.0|0.0   ;;  %v3676_v50 = vpack.c.bf16 %v2987_v41, %v2986_v40 }
 0x27b   : > { %3542 = vmatpush1.bf16.msra.mxu0 %v3541_v46  ;;  %v2990_v46 = vld [vmem:[%s5864_s5 + $0xe0] sm:$0xff] }
 0x27c   : > { %3544 = vmatprep.subr.bf16.mxu0 %v3543_v47  ;;  %v2991_v47 = vld [vmem:[%s5864_s5 + $0xe8] sm:$0xff] }
 0x27d   : > { %v3682_v48 = vpack.c.bf16 %v2991_v47, %v2990_v46  ;;  %v1491_v46 = vld [vmem:[%s5863_s4 + $0x48] sm:$0xff]  ;;  %v1493_v47 = vld [vmem:[%s5863_s4 + $0x58] sm:$0xff] }
 0x27f   : > { %3546 = vmatpush1.bf16.msra.mxu0 %v3545_v53  ;;  %v2994_v53 = vld [vmem:[%s5864_s5 + $0x100] sm:$0xff] }
 0x280   : > { %3548 = vmatprep.subr.bf16.mxu0 %v3547_v54  ;;  %v2995_v54 = vld [vmem:[%s5864_s5 + $0x108] sm:$0xff] }
 0x281   : > { %v3688_v55 = vpack.c.bf16 %v2995_v54, %v2994_v53  ;;  %v3603_v54 = vpack.c.bf16 %v1493_v47, %v1491_v46  ;;  %v2943_v46 = vld [vmem:[%s5863_s4 + $0x288] sm:$0xff]  ;;  %v2945_v47 = vld [vmem:[%s5863_s4 + $0x298] sm:$0xff] }
 0x283   : > { %3550 = vmatpush1.bf16.msra.mxu0 %v3549_v60  ;;  %v3691_v60 = vpack.c.bf16 %v2997_v57, %v2996_v56  ;;  %v1492_v56 = vld [vmem:[%s5863_s4 + $0x50] sm:$0xff] }
 0x284   : > { %3552 = vmatprep.subr.bf16.mxu0 %v3551_v61  ;;  %v2998_v61 = vld [vmem:[%s5864_s5 + $0x120] sm:$0xff] }
 0x285   : > { %v3694_v3 = vpack.c.bf16 %v2999_v63, %v2998_v61 }
 0x287   : > { %3554 = vmatpush1.bf16.msra.mxu0 %v3553_v1  ;;  %v1432_v1 = vrot.slane %v2896_v59, %v4600_v17  ;;  %v1495_v59 = vld [vmem:[%s5863_s4 + $0x68] sm:$0xff] }
 0x288   : > { %3675 = vmatprep.subr.bf16.mxu0 %v4008_v42 }
 0x28a   : > { %1410 = vmatmul.mubr.f32.vlgmr.msra.gmra.mrb[6].mxu0 %v1335_v58 }
 0x28b   : > { %2895 = vmatprep.mubr.msk.f32.mxu0 %vm990_vm5, %v1337_v62  ;;  %v3579_v62 = vpack.c.bf16 %v2925_v34, %v2923_v16  ;;  %3677 = vmatpush1.bf16.msra.mxu0 %v3676_v50 }
 0x28c   : > { %3678 = vmatprep.subr.bf16.mxu0 %v4008_v42 }
 0x28d   : > { %3580 = vmatprep.subr.bf16.mxu1 %v3579_v62 }
 0x28e   : > { %1416 = vmatmul.mubr.f32.gmra.mrb[8].mxu0 %v1334_v2  ;;  %3582 = vmatpush1.bf16.msra.mxu1 %v3581_v6  ;;  %v2897_v2 = vld [vmem:[%s5866_s7 + $0x5] ss:$8 sm:$0x3] }
 0x28f   : > { %3584 = vmatprep.subr.bf16.mxu1 %v3583_v8  ;;  %3680 = vmatpush1.bf16.msra.mxu0 %v3679_v45  ;;  %v1457_v26 = vrot.slane %v2897_v2, %v4605_v19  ;;  %v1453_v8 = vrot.slane %v2897_v2, %v4600_v17  ;;  %v1675_v45 = vrot.slane %v5073_v38, 6  ;;  %v1496_v2 = vld [vmem:[%s5863_s4 + $0x70] sm:$0xff] }
 0x290   : > { %3681 = vmatprep.subr.bf16.mxu0 %v4008_v42 }
 0x292   : > { %3586 = vmatpush1.bf16.msra.mxu1 %v3585_v11 }
 0x293   : > { %3588 = vmatprep.subr.bf16.mxu1 %v3587_v20  ;;  %3683 = vmatpush1.bf16.msra.mxu0 %v3682_v48  ;;  %v1577_v20 = vrot.slane %v5065_v35, 7  ;;  %v1488_v35 = vld [vmem:[%s5863_s4 + $0x30] sm:$0xff] }
 0x294   : > { %3684 = vmatprep.subr.bf16.mxu0 %v4008_v42  ;;  %v3601_v38 = vpack.c.bf16 %v1488_v35, %v1486_v12  ;;  %v1514_v35 = vld [vmem:[%s5863_s4 + $0x100] sm:$0xff] }
 0x296   : > { %3590 = vmatpush1.bf16.msra.mxu1 %v3589_v24 }
 0x297   : > { %3592 = vmatprep.subr.bf16.mxu1 %v3591_v30  ;;  %3686 = vmatpush1.bf16.msra.mxu0 %v3685_v52  ;;  %v1489_v30 = vld [vmem:[%s5863_s4 + $0x38] sm:$0xff] }
 0x298   : > { %3687 = vmatprep.subr.bf16.mxu0 %v4008_v42  ;;  %v3599_v37 = vpack.c.bf16 %v1489_v30, %v1487_v29  ;;  %v1512_v29 = vld [vmem:[%s5863_s4 + $0xf0] sm:$0xff]  ;;  %v1515_v30 = vld [vmem:[%s5863_s4 + $0x108] sm:$0xff] }
 0x29a   : > { %3594 = vmatpush1.bf16.msra.mxu1 %v3593_v32  ;;  %v3597_v32 = vpack.c.bf16 %v1484_v23, %v1482_v22  ;;  %v1513_v22 = vld [vmem:[%s5863_s4 + $0xf8] sm:$0xff] }
 0x29b   : > { %3596 = vmatprep.subr.bf16.mxu1 %v3595_v39  ;;  %3689 = vmatpush1.bf16.msra.mxu0 %v3688_v55  ;;  %v1490_v55 = vld [vmem:[%s5863_s4 + $0x40] sm:$0xff] }
 0x29c   : > { %3690 = vmatprep.subr.bf16.mxu0 %v4008_v42  ;;  %v3605_v63 = vpack.c.bf16 %v1492_v56, %v1490_v55  ;;  %v1672_v55 = vrot.slane %v5036_v13, 6  ;;  %v2946_v13 = vld [vmem:[%s5863_s4 + $0x2a0] sm:$0xff] }
 0x29f   : > { %3692 = vmatpush1.bf16.msra.mxu0 %v3691_v60  ;;  %v1497_v60 = vld [vmem:[%s5863_s4 + $0x78] sm:$0xff] }
 0x2a0   : > { %3693 = vmatprep.subr.bf16.mxu0 %v4008_v42 }
 0x2a3   : > { %3695 = vmatpush1.bf16.msra.mxu0 %v3694_v3  ;;  %v1499_v3 = vld [vmem:[%s5863_s4 + $0x88] sm:$0xff] }
 0x2a4   : > { %3696 = vmatprep.subr.bf16.mxu0 %v4008_v42 }
 0x35d   : > { %v1411_v58 = vpop.f32.mrb[6].mxu0 }
 0x35e   : > { %v1413_v33 = vpop.f32.mrb[7].mxu0  ;;  %v1439_v16 = vadd.f32 %v1432_v1, %v1411_v58  ;;  %v1501_v58 = vld [vmem:[%s5863_s4 + $0x98] sm:$0xff] }
 0x35f   : > { %v1440_v21 = vadd.f32 %v1436_v0, %v1413_v33 }
 0x360   : > { %v1443_v25 = vmax.f32 %v1439_v16, 0.0  ;;  %v1500_v16 = vld [vmem:[%s5863_s4 + $0x90] sm:$0xff] }
 0x361   : > { %v1444_v34 = vmax.f32 %v1440_v21, 0.0  ;;  %v1417_v62 = vpop.f32.mrb[8].mxu0  ;;  %v3611_v21 = vpack.c.bf16 %v1501_v58, %v1499_v3  ;;  %v2953_v3 = vld [vmem:[%s5863_s4 + $0x2d8] sm:$0xff] }
 0x362   : > { %v1441_v4 = vadd.f32 %v1432_v1, %v1417_v62  ;;  %v1419_v5 = vpop.f32.mrb[9].mxu0  ;;  %v5137_v15 = vadd.f32 %v1453_v8, %v1443_v25  ;;  %v1494_v1 = vld [vmem:[%s5863_s4 + $0x60] sm:$0xff]  ;;  %v1505_v62 = vld [vmem:[%s5863_s4 + $0xb8] sm:$0xff]  ;;  %v1507_v25 = vld [vmem:[%s5863_s4 + $0xc8] sm:$0xff] }
 0x363   : > { %v1461_v6 = vadd.f32 %v1457_v26, %v1444_v34  ;;  %v1442_v7 = vadd.f32 %v1436_v0, %v1419_v5  ;;  %v3607_v0 = vpack.c.bf16 %v1497_v60, %v1495_v59  ;;  %v3609_v33 = vpack.c.bf16 %v1496_v2, %v1494_v1  ;;  %v1503_v34 = vld [vmem:[%s5863_s4 + $0xa8] sm:$0xff]  ;;  %v2949_v59 = vld [vmem:[%s5863_s4 + $0x2b8] sm:$0xff] }
 0x364   : > { %v1445_v9 = vmax.f32 %v1441_v4, 0.0  ;;  %v1575_v28 = vrot.slane %v5137_v15, 7  ;;  %v3615_v5 = vpack.c.bf16 %v1505_v62, %v1503_v34  ;;  %v1673_v56 = vrot.slane %v5137_v15, 6  ;;  %v2957_v34 = vld [vmem:[%s5863_s4 + $0x2f8] sm:$0xff] }
 0x365   : > { %v1446_v10 = vmax.f32 %v1442_v7, 0.0  ;;  %1472 = vst.msk [vmem:[#allocation2 + $0x18] sm:$0xff] %vm1471_vm7, %v1461_v6  ;;  %v1502_v6 = vld [vmem:[%s5863_s4 + $0xa0] sm:$0xff]  ;;  %v1504_v7 = vld [vmem:[%s5863_s4 + $0xb0] sm:$0xff] }
 0x366   : > { %v1462_v11 = vadd.f32 %v1453_v8, %v1445_v9  ;;  %v1576_v50 = vsel %vm1573_vm9, %v1574_v27, %v1575_v28  ;;  %v1509_v8 = vld [vmem:[%s5863_s4 + $0xd8] sm:$0xff]  ;;  %v3617_v9 = vpack.c.bf16 %v1504_v7, %v1502_v6  ;;  %v1674_v1 = vsel %vm1671_vm10, %v1672_v55, %v1673_v56  ;;  %v2956_v6 = vld [vmem:[%s5863_s4 + $0x2f0] sm:$0xff]  ;;  %v2959_v7 = vld [vmem:[%s5863_s4 + $0x308] sm:$0xff] }
 0x367   : > { %v1463_v14 = vadd.f32 %v1457_v26, %v1446_v10  ;;  %v1498_v26 = vld [vmem:[%s5863_s4 + $0x80] sm:$0xff]  ;;  %v3619_v10 = vpack.c.bf16 %v1509_v8, %v1507_v25  ;;  %v2961_v25 = vld [vmem:[%s5863_s4 + $0x318] sm:$0xff] }
 0x368   : > { %1473 = vst [vmem:[#allocation2 + $0x20] sm:$0x3] %v1462_v11  ;;  %v3613_v4 = vpack.c.bf16 %v1500_v16, %v1498_v26  ;;  %v1506_v11 = vld [vmem:[%s5863_s4 + $0xc0] sm:$0xff]  ;;  %v2952_v26 = vld [vmem:[%s5863_s4 + $0x2d0] sm:$0xff]  ;;  %v3651_v8 = vpack.c.bf16 %v2961_v25, %v2959_v7 }
 0x369   : > { %1475 = vst.msk [vmem:[#allocation2 + $0x28] sm:$0x3] %vm1474_vm8, %v1463_v14  ;;  %v1508_v14 = vld [vmem:[%s5863_s4 + $0xd0] sm:$0xff] }
 0x36a   : > { %v3621_v23 = vpack.c.bf16 %v1508_v14, %v1506_v11  ;;  %v2963_v11 = vld [vmem:[%s5863_s4 + $0x328] sm:$0xff]  ;;  %v2965_v14 = vld [vmem:[%s5863_s4 + $0x338] sm:$0xff]  ;;  %v1962_v25 = vld [vmem:[%s5864_s5 + $0x70] sm:$0xff] }
 0x36c   : > { %v5146_v24 = vld [vmem:[#allocation2 + $0x18] sm:$0xff] }
 0x36d   : > { %v1578_v31 = vrot.slane %v5146_v24, 7  ;;  %1935 = vst [vmem:[#allocation2 + $0x18] sm:$0xff] %v5044_v18  ;;  %v1676_v49 = vrot.slane %v5146_v24, 6 }
 0x36f   : > { %v1579_v36 = vsel %vm1573_vm9, %v1577_v20, %v1578_v31  ;;  %v1524_v39 = vld [vmem:[#allocation2 + $0x20] sm:$0x7]  ;;  %v1677_v61 = vsel %vm1671_vm10, %v1675_v45, %v1676_v49  ;;  %v1511_v20 = vld [vmem:[%s5863_s4 + $0xe8] sm:$0xff]  ;;  %v1520_v45 = vld [vmem:[%s5863_s4 + $0x130] sm:$0xff] }
 0x370   : > { %v5165_v40 = vld [vmem:[#allocation2 + $0x20] sm:$0x3]  ;;  %2938 = vmatprep.mubr.msk.f32.mxu1 %vm1471_vm7, %v1579_v36  ;;  %v1525_v43 = vld [vmem:[#allocation2 + $0x28] sm:$0x7]  ;;  %v1580_v44 = vrot.slane %v1524_v39, 7  ;;  %v3623_v27 = vpack.c.bf16 %v1513_v22, %v1511_v20  ;;  %v1516_v36 = vld [vmem:[%s5863_s4 + $0x110] sm:$0xff]  ;;  %v3655_v22 = vpack.c.bf16 %v2965_v14, %v2963_v11 }
 0x371   : > { %v5167_v41 = vld [vmem:[#allocation2 + $0x20] sm:$0xf]  ;;  %1655 = vmatmul.mubr.f32.vlgmr.msra.gmra.mrb[4].mxu1 %v1576_v50  ;;  %v1582_v48 = vrot.slane %v1525_v43, 7  ;;  %v5180_v51 = vld [vmem:[#allocation2 + $0x28] sm:$0x3]  ;;  %v1521_v39 = vld [vmem:[%s5863_s4 + $0x138] sm:$0xff]  ;;  %v3629_v50 = vpack.c.bf16 %v1516_v36, %v1514_v35 }
 0x372   : > { %1936 = vst [vmem:[#allocation2 + $0x20] sm:$0xff] %v5044_v18  ;;  %v5182_v52 = vld [vmem:[#allocation2 + $0x28] sm:$0xf]  ;;  %3598 = vmatpush1.bf16.msra.mxu1 %v3597_v32  ;;  %v1581_v57 = vsel %vm1573_vm9, %v1575_v28, %v1580_v44  ;;  %v1510_v28 = vld [vmem:[%s5863_s4 + $0xe0] sm:$0xff]  ;;  %v1680_v60 = vrot.slane %v5180_v51, 6  ;;  %v1678_v2 = vrot.slane %v5165_v40, 6 }
 0x373   : > { %1937 = vst [vmem:[#allocation2 + $0x28] sm:$0xff] %v5044_v18  ;;  %v1583_v53 = vsel %vm1573_vm9, %v1578_v31, %v1582_v48  ;;  %3600 = vmatprep.subr.bf16.mxu1 %v3599_v37  ;;  %v1517_v31 = vld [vmem:[%s5863_s4 + $0x118] sm:$0xff]  ;;  %v3625_v32 = vpack.c.bf16 %v1512_v29, %v1510_v28  ;;  %v1519_v37 = vld [vmem:[%s5863_s4 + $0x128] sm:$0xff]  ;;  %v1518_v44 = vld [vmem:[%s5863_s4 + $0x120] sm:$0xff] }
 0x374   : > { %2939 = vmatprep.mubr.msk.f32.mxu1 %vm1471_vm7, %v1583_v53  ;;  %v3627_v12 = vpack.c.bf16 %v1517_v31, %v1515_v30  ;;  %v3631_v43 = vpack.c.bf16 %v1521_v39, %v1519_v37  ;;  %v3633_v48 = vpack.c.bf16 %v1520_v45, %v1518_v44  ;;  %v2942_v53 = vld [vmem:[%s5863_s4 + $0x280] sm:$0xff]  ;;  %v2951_v51 = vld [vmem:[%s5863_s4 + $0x2c8] sm:$0xff]  ;;  %v1681_v58 = vsel %vm1671_vm10, %v1676_v49, %v1680_v60  ;;  %v2969_v29 = vld [vmem:[%s5863_s4 + $0x358] sm:$0xff] }
 0x375   : > { %1661 = vmatmul.mubr.f32.gmra.mrb[6].mxu1 %v1581_v57  ;;  %v2947_v57 = vld [vmem:[%s5863_s4 + $0x2a8] sm:$0xff]  ;;  %v2950_v40 = vld [vmem:[%s5863_s4 + $0x2c0] sm:$0xff]  ;;  %v1679_v16 = vsel %vm1671_vm10, %v1673_v56, %v1678_v2  ;;  %v2973_v36 = vld [vmem:[%s5863_s4 + $0x378] sm:$0xff] }
 0x376   : > { %3602 = vmatpush1.bf16.msra.mxu1 %v3601_v38  ;;  %2940 = vmatprep.mubr.msk.f32.mxu1 %vm1471_vm7, %v1677_v61  ;;  %v3635_v38 = vpack.c.bf16 %v2945_v47, %v2943_v46  ;;  %v2955_v49 = vld [vmem:[%s5863_s4 + $0x2e8] sm:$0xff]  ;;  %v3645_v62 = vpack.c.bf16 %v2952_v26, %v2950_v40  ;;  %v2977_v45 = vld [vmem:[%s5863_s4 + $0x398] sm:$0xff]  ;;  %v1958_v26 = vld [vmem:[%s5864_s5 + $0x50] sm:$0xff] }
 0x377   : > { %3604 = vmatprep.subr.bf16.mxu1 %v3603_v54  ;;  %v2944_v54 = vld [vmem:[%s5863_s4 + $0x290] sm:$0xff]  ;;  %v2967_v28 = vld [vmem:[%s5863_s4 + $0x348] sm:$0xff]  ;;  %v1964_v14 = vld [vmem:[%s5864_s5 + $0x80] sm:$0xff] }
 0x378   : > { %v3637_v61 = vpack.c.bf16 %v2944_v54, %v2942_v53  ;;  %v3659_v31 = vpack.c.bf16 %v2969_v29, %v2967_v28  ;;  %v2971_v35 = vld [vmem:[%s5863_s4 + $0x368] sm:$0xff]  ;;  %v2981_v54 = vld [vmem:[%s5863_s4 + $0x3b8] sm:$0xff]  ;;  %v1966_v29 = vld [vmem:[%s5864_s5 + $0x90] sm:$0xff] }
 0x379   : > { %v3663_v39 = vpack.c.bf16 %v2973_v36, %v2971_v35  ;;  %v2975_v44 = vld [vmem:[%s5863_s4 + $0x388] sm:$0xff]  ;;  %v3006_v35 = vld [vmem:[%s5864_s5 + $0x160] sm:$0xff] }
 0x37a   : > { %3606 = vmatpush1.bf16.msra.mxu1 %v3605_v63  ;;  %v3639_v63 = vpack.c.bf16 %v2949_v59, %v2947_v57  ;;  %v3667_v47 = vpack.c.bf16 %v2977_v45, %v2975_v44  ;;  %v2979_v53 = vld [vmem:[%s5863_s4 + $0x3a8] sm:$0xff]  ;;  %v2978_v57 = vld [vmem:[%s5863_s4 + $0x3a0] sm:$0xff]  ;;  %v2980_v59 = vld [vmem:[%s5863_s4 + $0x3b0] sm:$0xff] }
 0x37b   : > { %3608 = vmatprep.subr.bf16.mxu1 %v3607_v0  ;;  %v2948_v0 = vld [vmem:[%s5863_s4 + $0x2b0] sm:$0xff]  ;;  %v3671_v56 = vpack.c.bf16 %v2981_v54, %v2979_v53  ;;  %v3673_v60 = vpack.c.bf16 %v2980_v59, %v2978_v57  ;;  %v3007_v36 = vld [vmem:[%s5864_s5 + $0x168] sm:$0xff]  ;;  %v3009_v45 = vld [vmem:[%s5864_s5 + $0x178] sm:$0xff] }
 0x37c   : > { %v3008_v44 = vld [vmem:[%s5864_s5 + $0x170] sm:$0xff]  ;;  %v1973_v53 = vld [vmem:[#allocation2 + $0x8] sm:$0x80] }
 0x37d   : > { %v1943_v54 = vld [vmem:[#allocation2 + $0x8] sm:$0xc0] }
 0x37e   : > { %3610 = vmatpush1.bf16.msra.mxu1 %v3609_v33  ;;  %v3641_v33 = vpack.c.bf16 %v2948_v0, %v2946_v13  ;;  %v1950_v0 = vld [vmem:[%s5864_s5 + $0x10] sm:$0xff]  ;;  %2311 = vst [vmem:[#allocation2 + $0x8] sm:$0xff] %v5044_v18  ;;  %v2985_v57 = vld [vmem:[%s5866_s7 + $0x7] ss:$8 sm:$0x3] }
 0x37f   : > { %3612 = vmatprep.subr.bf16.mxu1 %v3611_v21  ;;  %v3643_v21 = vpack.c.bf16 %v2953_v3, %v2951_v51  ;;  %v1952_v51 = vld [vmem:[%s5864_s5 + $0x20] sm:$0xff]  ;;  %v1953_v3 = vld [vmem:[%s5864_s5 + $0x28] sm:$0xff] }
 0x382   : > { %3614 = vmatpush1.bf16.msra.mxu1 %v3613_v4  ;;  %v3647_v4 = vpack.c.bf16 %v2957_v34, %v2955_v49  ;;  %v1960_v34 = vld [vmem:[%s5864_s5 + $0x60] sm:$0xff] }
 0x383   : > { %3616 = vmatprep.subr.bf16.mxu1 %v3615_v5  ;;  %v2954_v5 = vld [vmem:[%s5863_s4 + $0x2e0] sm:$0xff] }
 0x386   : > { %3618 = vmatpush1.bf16.msra.mxu1 %v3617_v9  ;;  %v2958_v9 = vld [vmem:[%s5863_s4 + $0x300] sm:$0xff] }
 0x387   : > { %3620 = vmatprep.subr.bf16.mxu1 %v3619_v10  ;;  %v2960_v10 = vld [vmem:[%s5863_s4 + $0x310] sm:$0xff] }
 0x388   : > { %v3653_v20 = vpack.c.bf16 %v2960_v10, %v2958_v9  ;;  %v3002_v9 = vld [vmem:[%s5864_s5 + $0x140] sm:$0xff]  ;;  %v3003_v10 = vld [vmem:[%s5864_s5 + $0x148] sm:$0xff] }
 0x389   : > { %v3700_v11 = vpack.c.bf16 %v3003_v10, %v3002_v9 }
 0x38a   : > { %3622 = vmatpush1.bf16.msra.mxu1 %v3621_v23  ;;  %v2962_v23 = vld [vmem:[%s5863_s4 + $0x320] sm:$0xff] }
 0x38b   : > { %3624 = vmatprep.subr.bf16.mxu1 %v3623_v27  ;;  %v2964_v27 = vld [vmem:[%s5863_s4 + $0x330] sm:$0xff] }
 0x38c   : > { %v3657_v30 = vpack.c.bf16 %v2964_v27, %v2962_v23  ;;  %v3004_v23 = vld [vmem:[%s5864_s5 + $0x150] sm:$0xff]  ;;  %v3005_v27 = vld [vmem:[%s5864_s5 + $0x158] sm:$0xff] }
 0x38d   : > { %v3703_v28 = vpack.c.bf16 %v3005_v27, %v3004_v23 }
 0x38e   : > { %3626 = vmatpush1.bf16.msra.mxu1 %v3625_v32  ;;  %v2966_v32 = vld [vmem:[%s5863_s4 + $0x340] sm:$0xff] }
 0x38f   : > { %3628 = vmatprep.subr.bf16.mxu1 %v3627_v12  ;;  %v2968_v12 = vld [vmem:[%s5863_s4 + $0x350] sm:$0xff] }
 0x390   : > { %v3661_v37 = vpack.c.bf16 %v2968_v12, %v2966_v32  ;;  %v1972_v32 = vld [vmem:[#allocation2] sm:$0x80] }
 0x391   : > { %v1942_v12 = vld [vmem:[#allocation2] sm:$0xc0] }
 0x392   : > { %3630 = vmatpush1.bf16.msra.mxu1 %v3629_v50  ;;  %v2970_v50 = vld [vmem:[%s5863_s4 + $0x360] sm:$0xff]  ;;  %2310 = vst [vmem:[#allocation2] sm:$0xff] %v5044_v18 }
 0x393   : > { %3632 = vmatprep.subr.bf16.mxu1 %v3631_v43  ;;  %v2972_v43 = vld [vmem:[%s5863_s4 + $0x370] sm:$0xff] }
 0x394   : > { %v3665_v46 = vpack.c.bf16 %v2972_v43, %v2970_v50  ;;  %v1969_v50 = vld [vmem:[%s5864_s5 + $0xa8] sm:$0xff] }
 0x396   : > { %3634 = vmatpush1.bf16.msra.mxu1 %v3633_v48  ;;  %v2974_v48 = vld [vmem:[%s5863_s4 + $0x380] sm:$0xff] }
 0x397   : > { %3636 = vmatprep.subr.bf16.mxu1 %v3635_v38  ;;  %v2976_v38 = vld [vmem:[%s5863_s4 + $0x390] sm:$0xff] }
 0x398   : > { %v3669_v55 = vpack.c.bf16 %v2976_v38, %v2974_v48  ;;  %v1971_v48 = vld [vmem:[%s5864_s5 + $0xb8] sm:$0xff] }
 0x399   : > { %1753 = vmatmul.mubr.f32.vlgmr.msra.gmra.mrb[4].mxu1 %v1674_v1  ;;  %v1951_v1 = vld [vmem:[%s5864_s5 + $0x18] sm:$0xff] }
 0x39a   : > { %2941 = vmatprep.mubr.msk.f32.mxu1 %vm1471_vm7, %v1681_v58  ;;  %3638 = vmatpush1.bf16.msra.mxu1 %v3637_v61  ;;  %v1948_v61 = vld [vmem:[%s5864_s5] sm:$0xff]  ;;  %v3715_v2 = vpack.c.bf16 %v1951_v1, %v1950_v0  ;;  %v3718_v58 = vpack.c.bf16 %v1953_v3, %v1952_v51  ;;  %v1925_v1 = vrot.slane %v2985_v57, %v4605_v19 }
 0x39b   : > { %3640 = vmatprep.subr.bf16.mxu1 %v3639_v63  ;;  %v1949_v63 = vld [vmem:[%s5864_s5 + $0x8] sm:$0xff] }
 0x39c   : > { %v3712_v13 = vpack.c.bf16 %v1949_v63, %v1948_v61  ;;  %v1921_v63 = vrot.slane %v2985_v57, %v4600_v17  ;;  %v3025_v57 = vld [vmem:[%s5864_s5 + $0x1d8] sm:$0xff] }
 0x39d   : > { %1759 = vmatmul.mubr.f32.gmra.mrb[6].mxu1 %v1679_v16  ;;  %v1959_v16 = vld [vmem:[%s5864_s5 + $0x58] sm:$0xff] }
 0x39e   : > { %3642 = vmatpush1.bf16.msra.mxu1 %v3641_v33  ;;  %2982 = vmatprep.mubr.msk.f32.mxu1 %vm1471_vm7, %v5146_v24  ;;  %v3649_v24 = vpack.c.bf16 %v2956_v6, %v2954_v5  ;;  %v3727_v49 = vpack.c.bf16 %v1959_v16, %v1958_v26  ;;  %v3000_v5 = vld [vmem:[%s5864_s5 + $0x130] sm:$0xff]  ;;  %v3001_v6 = vld [vmem:[%s5864_s5 + $0x138] sm:$0xff] }
 0x39f   : > { %3644 = vmatprep.subr.bf16.mxu1 %v3643_v21  ;;  %v1957_v21 = vld [vmem:[%s5864_s5 + $0x48] sm:$0xff]  ;;  %v3697_v7 = vpack.c.bf16 %v3001_v6, %v3000_v5  ;;  %v2010_v5 = vrot.slane %v1973_v53, 7  ;;  %v2105_v6 = vrot.slane %v1943_v54, 6  ;;  %v3022_v53 = vld [vmem:[%s5864_s5 + $0x1c0] sm:$0xff] }
 0x3a0   : > { %v3023_v54 = vld [vmem:[%s5864_s5 + $0x1c8] sm:$0xff] }
 0x3a1   : > { %3698 = vmatpush1.bf16.msra.mxu0 %v3697_v7  ;;  %v3014_v7 = vld [vmem:[%s5864_s5 + $0x180] sm:$0xff] }
 0x3a2   : > { %3646 = vmatpush1.bf16.msra.mxu1 %v3645_v62  ;;  %v1961_v62 = vld [vmem:[%s5864_s5 + $0x68] sm:$0xff]  ;;  %3699 = vmatprep.subr.bf16.mxu0 %v4008_v42 }
 0x3a3   : > { %3648 = vmatprep.subr.bf16.mxu1 %v3647_v4  ;;  %v3730_v4 = vpack.c.bf16 %v1961_v62, %v1960_v34 }
 0x3a5   : > { %3701 = vmatpush1.bf16.msra.mxu0 %v3700_v11  ;;  %v3016_v11 = vld [vmem:[%s5864_s5 + $0x190] sm:$0xff] }
 0x3a6   : > { %3650 = vmatpush1.bf16.msra.mxu1 %v3649_v24  ;;  %v1963_v24 = vld [vmem:[%s5864_s5 + $0x78] sm:$0xff]  ;;  %3702 = vmatprep.subr.bf16.mxu0 %v4008_v42 }
 0x3a7   : > { %3652 = vmatprep.subr.bf16.mxu1 %v3651_v8  ;;  %v3733_v8 = vpack.c.bf16 %v1963_v24, %v1962_v25  ;;  %v3015_v25 = vld [vmem:[%s5864_s5 + $0x188] sm:$0xff] }
 0x3a8   : > { %v3748_v10 = vpack.c.bf16 %v3015_v25, %v3014_v7  ;;  %v3046_v7 = vld [vmem:[%s5865_s6 + $0xa0] sm:$0xff]  ;;  %v3047_v25 = vld [vmem:[%s5865_s6 + $0xa8] sm:$0xff] }
 0x3a9   : > { %3704 = vmatpush1.bf16.msra.mxu0 %v3703_v28 }
 0x3aa   : > { %3654 = vmatpush1.bf16.msra.mxu1 %v3653_v20  ;;  %v1965_v20 = vld [vmem:[%s5864_s5 + $0x88] sm:$0xff]  ;;  %3705 = vmatprep.subr.bf16.mxu0 %v4008_v42 }
 0x3ab   : > { %3656 = vmatprep.subr.bf16.mxu1 %v3655_v22  ;;  %v3736_v22 = vpack.c.bf16 %v1965_v20, %v1964_v14  ;;  %v3017_v14 = vld [vmem:[%s5864_s5 + $0x198] sm:$0xff] }
 0x3ae   : > { %3658 = vmatpush1.bf16.msra.mxu1 %v3657_v30  ;;  %v1967_v30 = vld [vmem:[%s5864_s5 + $0x98] sm:$0xff] }
 0x3af   : > { %3660 = vmatprep.subr.bf16.mxu1 %v3659_v31  ;;  %v3739_v31 = vpack.c.bf16 %v1967_v30, %v1966_v29 }
 0x3b2   : > { %3662 = vmatpush1.bf16.msra.mxu1 %v3661_v37  ;;  %v3706_v37 = vpack.c.bf16 %v3007_v36, %v3006_v35 }
 0x3b3   : > { %3664 = vmatprep.subr.bf16.mxu1 %v3663_v39  ;;  %v1968_v39 = vld [vmem:[%s5864_s5 + $0xa0] sm:$0xff] }
 0x3b4   : > { %v3742_v43 = vpack.c.bf16 %v1969_v50, %v1968_v39  ;;  %3707 = vmatpush1.bf16.msra.mxu0 %v3706_v37  ;;  %v3751_v37 = vpack.c.bf16 %v3017_v14, %v3016_v11  ;;  %v3050_v11 = vld [vmem:[%s5865_s6 + $0xc0] sm:$0xff]  ;;  %v3051_v14 = vld [vmem:[%s5865_s6 + $0xc8] sm:$0xff] }
 0x3b5   : > { %3708 = vmatprep.subr.bf16.mxu0 %v4008_v42 }
 0x3b6   : > { %3666 = vmatpush1.bf16.msra.mxu1 %v3665_v46  ;;  %v1970_v46 = vld [vmem:[%s5864_s5 + $0xb0] sm:$0xff] }
 0x3b7   : > { %3668 = vmatprep.subr.bf16.mxu1 %v3667_v47  ;;  %v3709_v47 = vpack.c.bf16 %v3009_v45, %v3008_v44  ;;  %v3745_v38 = vpack.c.bf16 %v1971_v48, %v1970_v46  ;;  %v3019_v44 = vld [vmem:[%s5864_s5 + $0x1a8] sm:$0xff]  ;;  %v3021_v48 = vld [vmem:[%s5864_s5 + $0x1b8] sm:$0xff] }
 0x3b9   : > { %3710 = vmatpush1.bf16.msra.mxu0 %v3709_v47  ;;  %v3020_v47 = vld [vmem:[%s5864_s5 + $0x1b0] sm:$0xff] }
 0x3ba   : > { %3670 = vmatpush1.bf16.msra.mxu1 %v3669_v55  ;;  %3747 = vmatprep.subr.bf16.mxu0 %v4008_v42  ;;  %v2984_v55 = vld [vmem:[%s5866_s7 + $0x6] ss:$8 sm:$0x3] }
 0x3bb   : > { %3672 = vmatprep.subr.bf16.mxu1 %v3671_v56  ;;  %v1900_v56 = vrot.slane %v2984_v55, %v4600_v17  ;;  %v1904_v59 = vrot.slane %v2984_v55, %v4605_v19  ;;  %v3760_v55 = vpack.c.bf16 %v3023_v54, %v3022_v53 }
 0x3be   : > { %3674 = vmatpush1.bf16.msra.mxu1 %v3673_v60 }
 0x3bf   : > { %3711 = vmatprep.subr.bf16.mxu1 %v4008_v42 }
 0x3c1   : > { %1878 = vmatmul.mubr.f32.vlgmr.msra.gmra.mrb[4].mxu1 %v5137_v15  ;;  %v1954_v15 = vld [vmem:[%s5864_s5 + $0x30] sm:$0xff] }
 0x3c2   : > { %2983 = vmatprep.mubr.msk.f32.mxu1 %vm1471_vm7, %v5182_v52  ;;  %3713 = vmatpush1.bf16.msra.mxu1 %v3712_v13  ;;  %v1955_v52 = vld [vmem:[%s5864_s5 + $0x38] sm:$0xff] }
 0x3c3   : > { %3714 = vmatprep.subr.bf16.mxu1 %v4008_v42  ;;  %v3721_v33 = vpack.c.bf16 %v1955_v52, %v1954_v15 }
 0x3c5   : > { %1884 = vmatmul.mubr.f32.gmra.mrb[6].mxu1 %v5167_v41  ;;  %v1956_v41 = vld [vmem:[%s5864_s5 + $0x40] sm:$0xff] }
 0x3c6   : > { %3716 = vmatpush1.bf16.msra.mxu1 %v3715_v2  ;;  %v3724_v40 = vpack.c.bf16 %v1957_v21, %v1956_v41  ;;  %v2102_v41 = vrot.slane %v1942_v12, 6 }
 0x3c7   : > { %3717 = vmatprep.subr.bf16.mxu1 %v4008_v42 }
 0x3ca   : > { %3719 = vmatpush1.bf16.msra.mxu1 %v3718_v58 }
 0x3cb   : > { %3720 = vmatprep.subr.bf16.mxu1 %v4008_v42 }
 0x3ce   : > { %3722 = vmatpush1.bf16.msra.mxu1 %v3721_v33  ;;  %v2007_v33 = vrot.slane %v1972_v32, 7 }
 0x3cf   : > { %3723 = vmatprep.subr.bf16.mxu1 %v4008_v42 }
 0x3d2   : > { %3725 = vmatpush1.bf16.msra.mxu1 %v3724_v40 }
 0x3d3   : > { %3726 = vmatprep.subr.bf16.mxu1 %v4008_v42 }
 0x3d6   : > { %3728 = vmatpush1.bf16.msra.mxu1 %v3727_v49 }
 0x3d7   : > { %3729 = vmatprep.subr.bf16.mxu1 %v4008_v42 }
 0x3da   : > { %3731 = vmatpush1.bf16.msra.mxu1 %v3730_v4 }
 0x3db   : > { %3732 = vmatprep.subr.bf16.mxu1 %v4008_v42 }
 0x3de   : > { %3734 = vmatpush1.bf16.msra.mxu1 %v3733_v8 }
 0x3df   : > { %3735 = vmatprep.subr.bf16.mxu1 %v4008_v42 }
 0x3e2   : > { %3737 = vmatpush1.bf16.msra.mxu1 %v3736_v22 }
 0x3e3   : > { %3738 = vmatprep.subr.bf16.mxu1 %v4008_v42 }
 0x3e6   : > { %3740 = vmatpush1.bf16.msra.mxu1 %v3739_v31 }
 0x3e7   : > { %3741 = vmatprep.subr.bf16.mxu1 %v4008_v42 }
 0x3ea   : > { %3743 = vmatpush1.bf16.msra.mxu1 %v3742_v43  ;;  %v3018_v43 = vld [vmem:[%s5864_s5 + $0x1a0] sm:$0xff] }
 0x3eb   : > { %3744 = vmatprep.subr.bf16.mxu1 %v4008_v42  ;;  %v3754_v46 = vpack.c.bf16 %v3019_v44, %v3018_v43 }
 0x3ee   : > { %3746 = vmatpush1.bf16.msra.mxu1 %v3745_v38  ;;  %v3757_v38 = vpack.c.bf16 %v3021_v48, %v3020_v47 }
 0x494   : > { %v1879_v60 = vpop.f32.mrb[4].mxu1 }
 0x495   : > { %v1907_v61 = vadd.f32 %v1900_v56, %v1879_v60  ;;  %v1881_v13 = vpop.f32.mrb[5].mxu1  ;;  %v3026_v60 = vld [vmem:[%s5864_s5 + $0x1e0] sm:$0xff] }
 0x496   : > { %v1908_v0 = vadd.f32 %v1904_v59, %v1881_v13  ;;  %v3028_v13 = vld [vmem:[%s5864_s5 + $0x1f0] sm:$0xff] }
 0x497   : > { %v1911_v2 = vmax.f32 %v1907_v61, 0.0  ;;  %v3027_v61 = vld [vmem:[%s5864_s5 + $0x1e8] sm:$0xff] }
 0x498   : > { %v1912_v51 = vmax.f32 %v1908_v0, 0.0  ;;  %v1885_v3 = vpop.f32.mrb[6].mxu1  ;;  %v3029_v0 = vld [vmem:[%s5864_s5 + $0x1f8] sm:$0xff] }
 0x499   : > { %v5549_v58 = vadd.f32 %v1921_v63, %v1911_v2  ;;  %v1909_v15 = vadd.f32 %v1900_v56, %v1885_v3  ;;  %v1887_v52 = vpop.f32.mrb[7].mxu1  ;;  %v3024_v56 = vld [vmem:[%s5864_s5 + $0x1d0] sm:$0xff]  ;;  %v3030_v2 = vld [vmem:[%s5864_s5 + $0x200] sm:$0xff] }
 0x49a   : > { %v1929_v21 = vadd.f32 %v1925_v1, %v1912_v51  ;;  %v1910_v40 = vadd.f32 %v1904_v59, %v1887_v52  ;;  %v3763_v59 = vpack.c.bf16 %v3025_v57, %v3024_v56  ;;  %v3031_v51 = vld [vmem:[%s5864_s5 + $0x208] sm:$0xff]  ;;  %v3033_v52 = vld [vmem:[%s5864_s5 + $0x218] sm:$0xff] }
 0x49b   : > { %v1913_v26 = vmax.f32 %v1909_v15, 0.0  ;;  %v2008_v16 = vrot.slane %v5549_v58, 7  ;;  %v2103_v17 = vrot.slane %v5549_v58, 6  ;;  %v3772_v3 = vpack.c.bf16 %v3031_v51, %v3030_v2  ;;  %v3032_v15 = vld [vmem:[%s5864_s5 + $0x210] sm:$0xff]  ;;  %v2318_v2 = vld [vmem:[#allocation2] sm:$0xc0] }
 0x49c   : > { %1939 = vst.msk [vmem:[#allocation2 + $0x18] sm:$0xff] %vm990_vm5, %v1929_v21  ;;  %v1914_v49 = vmax.f32 %v1910_v40, 0.0  ;;  %v3035_v21 = vld [vmem:[%s5864_s5 + $0x228] sm:$0xff] }
 0x49d   : > { %v1930_v19 = vadd.f32 %v1921_v63, %v1913_v26  ;;  %v2009_v34 = vsel %vm1573_vm9, %v2007_v33, %v2008_v16  ;;  %v2104_v62 = vsel %vm1671_vm10, %v2102_v41, %v2103_v17  ;;  %v3766_v63 = vpack.c.bf16 %v3027_v61, %v3026_v60  ;;  %v3034_v41 = vld [vmem:[%s5864_s5 + $0x220] sm:$0xff]  ;;  %v3036_v26 = vld [vmem:[%s5864_s5 + $0x230] sm:$0xff] }
 0x49e   : > { %v1931_v4 = vadd.f32 %v1925_v1, %v1914_v49  ;;  %v3769_v1 = vpack.c.bf16 %v3029_v0, %v3028_v13  ;;  %v3775_v33 = vpack.c.bf16 %v3033_v52, %v3032_v15  ;;  %v3778_v40 = vpack.c.bf16 %v3035_v21, %v3034_v41  ;;  %v3040_v49 = vld [vmem:[%s5865_s6 + $0x70] sm:$0xff]  ;;  %v2324_v15 = vld [vmem:[%s5865_s6 + $0x18] sm:$0xff] }
 0x49f   : > { %1940 = vst [vmem:[#allocation2 + $0x20] sm:$0xf] %v1930_v19  ;;  %v3041_v19 = vld [vmem:[%s5865_s6 + $0x78] sm:$0xff] }
 0x4a0   : > { %1941 = vst.msk [vmem:[#allocation2 + $0x28] sm:$0xf] %vm993_vm6, %v1931_v4  ;;  %v3044_v4 = vld [vmem:[%s5865_s6 + $0x90] sm:$0xff] }
 0x4a3   : > { %v1945_v24 = vld [vmem:[#allocation2 + $0x18] sm:$0xff] }
 0x4a4   : > { %v2011_v8 = vrot.slane %v1945_v24, 7  ;;  %2313 = vst [vmem:[#allocation2 + $0x18] sm:$0xff] %v5044_v18  ;;  %v2106_v9 = vrot.slane %v1945_v24, 6 }
 0x4a6   : > { %v2012_v20 = vsel %vm1573_vm9, %v2010_v5, %v2011_v8  ;;  %v2107_v22 = vsel %vm1671_vm10, %v2105_v6, %v2106_v9  ;;  %v1974_v23 = vld [vmem:[#allocation2 + $0x20] sm:$0x1f]  ;;  %v3045_v5 = vld [vmem:[%s5865_s6 + $0x98] sm:$0xff] }
 0x4a7   : > { %v1946_v27 = vld [vmem:[#allocation2 + $0x20] sm:$0xf]  ;;  %3010 = vmatprep.mubr.msk.f32.mxu0 %vm990_vm5, %v2012_v20  ;;  %3012 = vmatprep.mubr.msk.f32.mxu1 %vm990_vm5, %v2107_v22  ;;  %v1975_v29 = vld [vmem:[#allocation2 + $0x28] sm:$0x1f]  ;;  %v2013_v31 = vrot.slane %v1974_v23, 7  ;;  %v3791_v6 = vpack.c.bf16 %v3045_v5, %v3044_v4  ;;  %v3803_v20 = vpack.c.bf16 %v3051_v14, %v3050_v11  ;;  %v3052_v22 = vld [vmem:[%s5865_s6 + $0xd0] sm:$0xff] }
 0x4a8   : > { %v5572_v28 = vld [vmem:[#allocation2 + $0x20] sm:$0x3f]  ;;  %v1947_v30 = vld [vmem:[#allocation2 + $0x28] sm:$0xf]  ;;  %v2108_v32 = vrot.slane %v1946_v27, 6  ;;  %2088 = vmatmul.mubr.f32.vlgmr.msra.gmra.mrb[10].mxu0 %v2009_v34  ;;  %2183 = vmatmul.mubr.f32.vlgmr.msra.gmra.mrb[8].mxu1 %v2104_v62  ;;  %v2015_v12 = vrot.slane %v1975_v29, 7  ;;  %v3783_v34 = vpack.c.bf16 %v3041_v19, %v3040_v49 }
 0x4a9   : > { %2314 = vst [vmem:[#allocation2 + $0x20] sm:$0xff] %v5044_v18  ;;  %v2110_v35 = vrot.slane %v1947_v30, 6  ;;  %v5577_v36 = vld [vmem:[#allocation2 + $0x28] sm:$0x3f]  ;;  %3749 = vmatpush1.bf16.msra.mxu0 %v3748_v10  ;;  %v3053_v23 = vld [vmem:[%s5865_s6 + $0xd8] sm:$0xff] }
 0x4aa   : > { %2315 = vst [vmem:[#allocation2 + $0x28] sm:$0xff] %v5044_v18  ;;  %v2016_v39 = vsel %vm1573_vm9, %v2011_v8, %v2015_v12  ;;  %3750 = vmatprep.subr.bf16.mxu0 %v4008_v42  ;;  %v2014_v18 = vsel %vm1573_vm9, %v2008_v16, %v2013_v31  ;;  %v2109_v45 = vsel %vm1671_vm10, %v2103_v17, %v2108_v32  ;;  %v3037_v16 = vld [vmem:[%s5864_s5 + $0x238] sm:$0xff]  ;;  %v3048_v8 = vld [vmem:[%s5865_s6 + $0xb0] sm:$0xff]  ;;  %v2322_v29 = vld [vmem:[%s5865_s6 + $0x8] sm:$0xff] }
 0x4ab   : > { %v2111_v50 = vsel %vm1671_vm10, %v2106_v9, %v2110_v35  ;;  %3011 = vmatprep.mubr.msk.f32.mxu0 %vm990_vm5, %v2016_v39  ;;  %v3781_v17 = vpack.c.bf16 %v3037_v16, %v3036_v26  ;;  %3784 = vmatprep.subr.bf16.mxu1 %v3783_v34  ;;  %v3049_v9 = vld [vmem:[%s5865_s6 + $0xb8] sm:$0xff]  ;;  %v3807_v27 = vpack.c.bf16 %v3053_v23, %v3052_v22  ;;  %v2325_v16 = vld [vmem:[%s5865_s6 + $0x20] sm:$0xff]  ;;  %v2330_v4 = vld [vmem:[%s5865_s6 + $0x48] sm:$0xff] }
 0x4ac   : > { %3013 = vmatprep.mubr.msk.f32.mxu1 %vm990_vm5, %v2111_v50  ;;  %2093 = vmatmul.mubr.f32.gmra.mrb[12].mxu0 %v2014_v18  ;;  %v3799_v10 = vpack.c.bf16 %v3049_v9, %v3048_v8  ;;  %v2334_v8 = vld [vmem:[%s5865_s6 + $0x68] sm:$0xff]  ;;  %v3060_v23 = vld [vmem:[%s5865_s6 + $0xf0] sm:$0xff] }
 0x4ad   : > { %2188 = vmatmul.mubr.f32.gmra.mrb[10].mxu1 %v2109_v45  ;;  %3752 = vmatpush1.bf16.msra.mxu0 %v3751_v37  ;;  %v2302_v45 = vld [vmem:[%s5866_s7 + $0x10] ss:$0 sm:$0xff]  ;;  %v3059_v11 = vld [vmem:[%s5865_s6 + $0xe8] sm:$0xff] }
 0x4ae   : > { %3038 = vmatprep.mubr.msk.f32.mxu0 %vm990_vm5, %v1945_v24  ;;  %3753 = vmatprep.subr.bf16.mxu0 %v4008_v42  ;;  %v3795_v24 = vpack.c.bf16 %v3047_v25, %v3046_v7  ;;  %v2332_v7 = vld [vmem:[%s5865_s6 + $0x58] sm:$0xff] }
 0x4af   : > { %3786 = vmatpush3.bf16.msra.mxu1 %v3783_v34  ;;  %v2328_v34 = vld [vmem:[%s5865_s6 + $0x38] sm:$0xff] }
 0x4b1   : > { %3755 = vmatpush1.bf16.msra.mxu0 %v3754_v46 }
 0x4b2   : > { %3756 = vmatprep.subr.bf16.mxu0 %v4008_v42 }
 0x4b5   : > { %3758 = vmatpush1.bf16.msra.mxu0 %v3757_v38  ;;  %v2307_v38 = vld [vmem:[%s5866_s7 + $0x11] ss:$0 sm:$0xff] }
 0x4b6   : > { %3759 = vmatprep.subr.bf16.mxu0 %v4008_v42 }
 0x4b9   : > { %3761 = vmatpush1.bf16.msra.mxu0 %v3760_v55 }
 0x4ba   : > { %3762 = vmatprep.subr.bf16.mxu0 %v4008_v42 }
 0x4bd   : > { %3764 = vmatpush1.bf16.msra.mxu0 %v3763_v59 }
 0x4be   : > { %3765 = vmatprep.subr.bf16.mxu0 %v4008_v42 }
 0x4c1   : > { %3767 = vmatpush1.bf16.msra.mxu0 %v3766_v63  ;;  %v2335_v63 = vld [vmem:[#allocation2] sm:$0x80] }
 0x4c2   : > { %3768 = vmatprep.subr.bf16.mxu0 %v4008_v42  ;;  %v2355_v13 = vrot.slane %v2335_v63, 7 }
 0x4c5   : > { %3770 = vmatpush1.bf16.msra.mxu0 %v3769_v1 }
 0x4c6   : > { %3771 = vmatprep.subr.bf16.mxu0 %v4008_v42 }
 0x4c9   : > { %3773 = vmatpush1.bf16.msra.mxu0 %v3772_v3  ;;  %v2323_v3 = vld [vmem:[%s5865_s6 + $0x10] sm:$0xff] }
 0x4ca   : > { %3774 = vmatprep.subr.bf16.mxu0 %v4008_v42 }
 0x4cd   : > { %3776 = vmatpush1.bf16.msra.mxu0 %v3775_v33  ;;  %v2441_v33 = vrot.slane %v2318_v2, 6 }
 0x4ce   : > { %3777 = vmatprep.subr.bf16.mxu0 %v4008_v42 }
 0x4d1   : > { %3779 = vmatpush1.bf16.msra.mxu0 %v3778_v40  ;;  %v3815_v40 = vpack.c.bf16 %v2324_v15, %v2323_v3 }
 0x4d2   : > { %3780 = vmatprep.subr.bf16.mxu0 %v4008_v42  ;;  %v3042_v42 = vld [vmem:[%s5865_s6 + $0x80] sm:$0xff] }
 0x4d5   : > { %3782 = vmatpush1.bf16.msra.mxu0 %v3781_v17  ;;  %v2326_v17 = vld [vmem:[%s5865_s6 + $0x28] sm:$0xff] }
 0x4d6   : > { %v3819_v19 = vpack.c.bf16 %v2326_v17, %v2325_v16 }
 0x4d8   : > { %2290 = vmatmul.mubr.f32.vlgmr.msra.gmra.mrb[14].mxu0 %v5549_v58  ;;  %v3043_v58 = vld [vmem:[%s5865_s6 + $0x88] sm:$0xff] }
 0x4d9   : > { %3039 = vmatprep.mubr.msk.f32.mxu0 %vm990_vm5, %v5577_v36  ;;  %v3787_v62 = vpack.c.bf16 %v3043_v58, %v3042_v42  ;;  %v2327_v42 = vld [vmem:[%s5865_s6 + $0x30] sm:$0xff] }
 0x4da   : > { %v3823_v58 = vpack.c.bf16 %v2328_v34, %v2327_v42 }
 0x4db   : > { %3788 = vmatprep.subr.bf16.mxu1 %v3787_v62 }
 0x4dc   : > { %2295 = vmatmul.mubr.f32.gmra.mrb[16].mxu0 %v5572_v28  ;;  %3790 = vmatpush3.bf16.msra.mxu1 %v3787_v62  ;;  %v2321_v28 = vld [vmem:[%s5865_s6] sm:$0xff] }
 0x4dd   : > { %3792 = vmatprep.subr.bf16.mxu1 %v3791_v6  ;;  %v3811_v30 = vpack.c.bf16 %v2322_v29, %v2321_v28  ;;  %v2329_v62 = vld [vmem:[%s5865_s6 + $0x40] sm:$0xff] }
 0x4de   : > { %v3827_v5 = vpack.c.bf16 %v2330_v4, %v2329_v62 }
 0x4e0   : > { %3794 = vmatpush3.bf16.msra.mxu1 %v3791_v6  ;;  %v2331_v6 = vld [vmem:[%s5865_s6 + $0x50] sm:$0xff] }
 0x4e1   : > { %3796 = vmatprep.subr.bf16.mxu1 %v3795_v24  ;;  %v3831_v25 = vpack.c.bf16 %v2332_v7, %v2331_v6 }
 0x4e4   : > { %3798 = vmatpush3.bf16.msra.mxu1 %v3795_v24  ;;  %v2333_v24 = vld [vmem:[%s5865_s6 + $0x60] sm:$0xff] }
 0x4e5   : > { %3800 = vmatprep.subr.bf16.mxu1 %v3799_v10  ;;  %v3835_v9 = vpack.c.bf16 %v2334_v8, %v2333_v24 }
 0x4e8   : > { %3802 = vmatpush3.bf16.msra.mxu1 %v3799_v10  ;;  %v3058_v10 = vld [vmem:[%s5865_s6 + $0xe0] sm:$0xff] }
 0x4e9   : > { %3804 = vmatprep.subr.bf16.mxu1 %v3803_v20 }
 0x4ec   : > { %3806 = vmatpush3.bf16.msra.mxu1 %v3803_v20  ;;  %v3839_v20 = vpack.c.bf16 %v3059_v11, %v3058_v10 }
 0x4ed   : > { %3808 = vmatprep.subr.bf16.mxu1 %v3807_v27 }
 0x4f0   : > { %3810 = vmatpush3.bf16.msra.mxu1 %v3807_v27  ;;  %v3061_v27 = vld [vmem:[%s5865_s6 + $0xf8] sm:$0xff] }
 0x4f1   : > { %3812 = vmatprep.subr.bf16.mxu1 %v3811_v30  ;;  %v3843_v28 = vpack.c.bf16 %v3061_v27, %v3060_v23 }
 0x57b   : > { %v2089_v31 = vpop.f32.mrb[10].mxu0  ;;  %v2184_v32 = vpop.f32.mrb[8].mxu1 }
 0x57c   : > { %v2185_v12 = vadd.f32 %v2184_v32, %v2089_v31  ;;  %v2091_v35 = vpop.f32.mrb[11].mxu0  ;;  %v2186_v36 = vpop.f32.mrb[9].mxu1  ;;  %v3063_v31 = vld [vmem:[%s5865_s6 + $0x108] sm:$0xff] }
 0x57d   : > { %v3065_v35 = vld [vmem:[%s5865_s6 + $0x118] sm:$0xff] }
 0x57f   : > { %v2094_v37 = vpop.f32.mrb[12].mxu0 }
 0x580   : > { %v2189_v39 = vpop.f32.mrb[10].mxu1  ;;  %v2096_v43 = vpop.f32.mrb[13].mxu0 }
 0x581   : > { %v2190_v50 = vadd.f32 %v2189_v39, %v2094_v37  ;;  %v2191_v44 = vpop.f32.mrb[11].mxu1  ;;  %v3066_v37 = vld [vmem:[%s5865_s6 + $0x120] sm:$0xff]  ;;  %v3067_v39 = vld [vmem:[%s5865_s6 + $0x128] sm:$0xff]  ;;  %v3068_v43 = vld [vmem:[%s5865_s6 + $0x130] sm:$0xff] }
 0x582   : > { %v3069_v44 = vld [vmem:[%s5865_s6 + $0x138] sm:$0xff] }
 0x5ab   : > { %v2291_v18 = vpop.f32.mrb[14].mxu0 }
 0x5ac   : > { %v2300_v46 = vadd.f32 %v2291_v18, %v2185_v12  ;;  %v2293_v47 = vpop.f32.mrb[15].mxu0  ;;  %v3064_v12 = vld [vmem:[%s5865_s6 + $0x110] sm:$0xff]  ;;  %v3859_v18 = vpack.c.bf16 %v3069_v44, %v3068_v43 }
 0x5ad   : > { %v3851_v36 = vpack.c.bf16 %v3065_v35, %v3064_v12 }
 0x5ae   : > { %v2303_v48 = vadd.f32 %v2302_v45, %v2300_v46  ;;  %v3071_v46 = vld [vmem:[%s5865_s6 + $0x148] sm:$0xff] }
 0x5af   : > { %v2296_v53 = vpop.f32.mrb[16].mxu0 }
 0x5b0   : > { %v2305_v54 = vmax.f32 %v2303_v48, 0.0  ;;  %v2301_v55 = vadd.f32 %v2296_v53, %v2190_v50  ;;  %v2298_v56 = vpop.f32.mrb[17].mxu0  ;;  %v3855_v50 = vpack.c.bf16 %v3067_v39, %v3066_v37 }
 0x5b2   : > { %v2308_v57 = vadd.f32 %v2307_v38, %v2305_v54  ;;  %v2304_v59 = vadd.f32 %v2302_v45, %v2301_v55  ;;  %v3070_v45 = vld [vmem:[%s5865_s6 + $0x140] sm:$0xff] }
 0x5b3   : > { %v3863_v47 = vpack.c.bf16 %v3071_v46, %v3070_v45 }
 0x5b4   : > { %2316 = vst.msk [vmem:[#allocation2 + $0x10] sm:$0xff] %vm596_vm4, %v2308_v57  ;;  %v2306_v60 = vmax.f32 %v2304_v59, 0.0 }
 0x5b6   : > { %v2309_v61 = vadd.f32 %v2307_v38, %v2306_v60  ;;  %v2623_v38 = vld [vmem:[%s5866_s7 + $0x12] ss:$0 sm:$0xff] }
 0x5b8   : > { %2317 = vst.msk [vmem:[#allocation2 + $0x20] sm:$0x3f] %vm598_vm3, %v2309_v61 }
 0x5bb   : > { %v2319_v0 = vld [vmem:[#allocation2 + $0x10] sm:$0xff] }
 0x5bc   : > { %v2356_v1 = vrot.slane %v2319_v0, 7  ;;  %v2442_v41 = vrot.slane %v2319_v0, 6 }
 0x5be   : > { %v2357_v51 = vsel %vm1573_vm9, %v2355_v13, %v2356_v1  ;;  %v2443_v49 = vsel %vm1671_vm10, %v2441_v33, %v2442_v41 }
 0x5bf   : > { %3226 = vmatprep.mubr.msk.f32.mxu1 %vm596_vm4, %v2357_v51  ;;  %v2336_v52 = vld [vmem:[#allocation2 + $0x20] sm:$0x7f] }
 0x5c0   : > { %v2358_v21 = vrot.slane %v2336_v52, 7  ;;  %v2320_v14 = vld [vmem:[#allocation2 + $0x20] sm:$0x3f] }
 0x5c1   : > { %v2444_v22 = vrot.slane %v2320_v14, 6  ;;  %v2525_v48 = vld [vmem:[#allocation2 + $0x20] sm:$0xff] }
 0x5c2   : > { %v2359_v26 = vsel %vm1573_vm9, %v2356_v1, %v2358_v21 }
 0x5c3   : > { %3227 = vmatmul.mubr.msk.f32.vlgmr.msra.gmra.mrb[12].mxu1 %vm596_vm4, %v2359_v26  ;;  %v2445_v29 = vsel %vm1671_vm10, %v2442_v41, %v2444_v22 }
 0x5c4   : > { %3814 = vmatpush3.bf16.msra.mxu1 %v3811_v30  ;;  %3257 = vmatprep.mubr.msk.f32.mxu1 %vm596_vm4, %v2443_v49  ;;  %v3062_v30 = vld [vmem:[%s5865_s6 + $0x100] sm:$0xff] }
 0x5c5   : > { %3816 = vmatprep.subr.bf16.mxu1 %v3815_v40  ;;  %v3847_v32 = vpack.c.bf16 %v3063_v31, %v3062_v30 }
 0x5c8   : > { %3818 = vmatpush3.bf16.msra.mxu1 %v3815_v40 }
 0x5c9   : > { %3820 = vmatprep.subr.bf16.mxu1 %v3819_v19 }
 0x5cc   : > { %3822 = vmatpush3.bf16.msra.mxu1 %v3819_v19 }
 0x5cd   : > { %3824 = vmatprep.subr.bf16.mxu1 %v3823_v58 }
 0x5d0   : > { %3826 = vmatpush3.bf16.msra.mxu1 %v3823_v58 }
 0x5d1   : > { %3828 = vmatprep.subr.bf16.mxu1 %v3827_v5 }
 0x5d4   : > { %3830 = vmatpush3.bf16.msra.mxu1 %v3827_v5 }
 0x5d5   : > { %3832 = vmatprep.subr.bf16.mxu1 %v3831_v25 }
 0x5d8   : > { %3834 = vmatpush3.bf16.msra.mxu1 %v3831_v25 }
 0x5d9   : > { %3836 = vmatprep.subr.bf16.mxu1 %v3835_v9 }
 0x5dc   : > { %3838 = vmatpush3.bf16.msra.mxu1 %v3835_v9 }
 0x5dd   : > { %3840 = vmatprep.subr.bf16.mxu1 %v3839_v20 }
 0x5df   : > { %3258 = vmatmul.mubr.msk.f32.vlgmr.msra.gmra.mrb[12].mxu1 %vm596_vm4, %v2445_v29 }
 0x5e0   : > { %3842 = vmatpush3.bf16.msra.mxu1 %v3839_v20  ;;  %3288 = vmatprep.mubr.msk.f32.mxu1 %vm596_vm4, %v2319_v0 }
 0x5e1   : > { %3844 = vmatprep.subr.bf16.mxu1 %v3843_v28 }
 0x5e4   : > { %3846 = vmatpush3.bf16.msra.mxu1 %v3843_v28 }
 0x5e5   : > { %3848 = vmatprep.subr.bf16.mxu1 %v3847_v32 }
 0x5e8   : > { %3850 = vmatpush3.bf16.msra.mxu1 %v3847_v32 }
 0x5e9   : > { %3852 = vmatprep.subr.bf16.mxu1 %v3851_v36 }
 0x5ec   : > { %3854 = vmatpush3.bf16.msra.mxu1 %v3851_v36 }
 0x5ed   : > { %3856 = vmatprep.subr.bf16.mxu1 %v3855_v50 }
 0x5f0   : > { %3858 = vmatpush3.bf16.msra.mxu1 %v3855_v50 }
 0x5f1   : > { %3860 = vmatprep.subr.bf16.mxu1 %v3859_v18 }
 0x5f4   : > { %3862 = vmatpush3.bf16.msra.mxu1 %v3859_v18 }
 0x5f5   : > { %3864 = vmatprep.subr.bf16.mxu1 %v3863_v47 }
 0x5f8   : > { %3866 = vmatpush3.bf16.msra.mxu1 %v3863_v47 }
 0x5fb   : > { %3289 = vmatmul.mubr.msk.f32.vlgmr.msra.gmra.mrb[12].mxu1 %vm596_vm4, %v2525_v48 }
 0x6ce   : > { %v3290_v53 = vpop.f32.mrb[12].mxu1 }
 0x6cf   : > { %v2625_v54 = vadd.f32 %v3290_v53, %v2623_v38  ;;  %v2612_v55 = vpop.f32.mrb[13].mxu1 }
 0x6d0   : > { %v2624_v56 = vadd.f32 %v2623_v38, %v2612_v55 }
 0x6d1   : > { %2628 = vst.msk [vmem:[%s298_s18 + $0x8] sm:$0xff] %vm2626_vm11, %v2625_v54 }
 0x6d2   : > { %2627 = vst.msk [vmem:[%s298_s18] sm:$0xff] %vm2626_vm11, %v2624_v56 }
 0x6d3   : > { %3956 = shalt.err (!%p3953_p3)
}
 0x6d4   : > { %s3957_s10 = scalar_lea.hbm %s5816_s23, 256  ;;  %s3961_s18 = scalar_lea.hbm %s5867_s8, 512 }
 0x6d5   : > { %p3958_p4 = scmp.ne.s32.totalorder %s5816_s23, %s3957_s10  ;;  %p3962_p9 = scmp.lt.u32.totalorder %s5816_s23, %s5867_s8 }
 0x6d6   : > { %p3963_p10 = scmp.lt.u32.totalorder %s3961_s18, %s3957_s10  ;;  %p3965_p12 = scmp.lt.u32.totalorder %s3957_s10, %s5816_s23 }
 0x6d7   : > { %p3959_p7 = pnand %p3958_p4, %p4095_p5 }
 0x6d8   : > { %p3964_p11 = por %p3963_p10, %p3962_p9 }
 0x6d9   : > { %p3960_p8 = pneg %p3959_p7 }
 0x6da   : > { %p3966_p13 = por %p3965_p12, %p3964_p11 }
 0x6dc   : > { %p3967_p0 = pnand %p3966_p13, %p3960_p8 }
 0x6de   : > { %3970 = shalt.err (!%p3967_p0)
}
 0x6df   : > { %s4010_s22 = smov 128   ;;  %s4011_s9 = smov 8  }
 0x6e0   : > { %3899 = dma.vmem_to_hbm [thread:$0]  (%p4095_p5), %s5811_s19, 256, %s5816_s23, %s5818_s24, %s4010_s22, %s4010_s22, %s4011_s9  }
 0x6e1 PF: > { %p3905_p1 = scmp.ge.s32.totalorder %s4005_s30, 2  ;;  %s2658_s25 = sand.u32 1, %s3993_s27  }
 0x6e2   : > { %s2659_s26 = scalar_lea.sflag [#allocation4], %s2658_s25 }
 0x6e3   : > { %p3902_p2 = pnand %p3905_p1, %p4099_p6 }
 0x6e5   : > { %3988 = dma.done.wait (!%p3902_p2), %s2659_s26, 256  }
 0x6e6   : > { %3990 = vsyncadd (!%p3902_p2), %s2659_s26, 4294967040  ;;  %p18_p3 = scmp.ge.s32.totalorder %s4082_s11, 4   ;;  %s5870_s27 = smov %s3997_s28 }
 0x6e7   : > { %s5871_s28 = smov %s4001_s29  ;;  %s5872_s29 = smov %s4093_s14 }
 0x6e8   : > { %s5873_s30 = smov %s4082_s11  ;;  %20 = sbr.rel (!%p18_p3) target bundleno = 3 (0x3), region = 105 }
 0x6ef   :  { %2664 = vsyncpa [#allocation4], 1 }
 0x6f0   :  { %2666 = vsyncpa [#allocation4 + $0x1], 1 }

</bundles_post_ra>
